<compile_context>
chip_gen: v7x
topology: tpu7x:2x2x1
jax: 0.10.0
libtpu: 0.0.40
codegen_flags: <defaults>
</compile_context>

<pallas_src>
import functools

import jax
import jax.numpy as jnp
from jax.experimental import pallas as pl
from jax.experimental.pallas import tpu as pltpu

BN_EPS = 1e-5
_HI = jax.lax.Precision.HIGHEST   # only used by the pure-JAX reference
_PAD = 128                        # lane margin in the flat padded scratch (>= 2*W+2)

# Union of spatial tap offsets (dy, dx) relative to the output pixel:
#   conv1 (3x3, dilation 2, pad 2): {-2, 0, 2}^2
#   conv2 (3x3, pad 1)            : {-1, 0, 1}^2
_TAPS = sorted(set((2 * ky - 2, 2 * kx - 2) for ky in range(3) for kx in range(3))
               | set((ky - 1, kx - 1) for ky in range(3) for kx in range(3)))


def _tblock_kernel(x_ref, wconv_ref, bias_ref, gamma_ref, beta_ref,
                   fw1_ref, fb1_ref, fw2_ref, fb2_ref,
                   out_ref, xpad_ref, xcol_ref, ybuf_ref, *, W):
    N, C, HW = x_ref.shape           # x in flattened NCHW: (N, C, H*W)
    C2 = 2 * C
    M = N * HW                       # elements per channel for BN batch stats

    # ---- flat copy of x with zero lane margins: zero ONLY the margins ----
    xpad_ref[:, :, :_PAD] = jnp.zeros((N, C, _PAD), jnp.float32)
    xpad_ref[:, :, _PAD + HW:] = jnp.zeros((N, C, _PAD), jnp.float32)
    xpad_ref[:, :, _PAD:_PAD + HW] = x_ref[...]

    # ---- hoisted column masks (dx in {-2,-1,1,2}); vertical under/overflow is
    #      absorbed by the zero margins, and dx==0 taps need no mask at all ----
    lane = jax.lax.broadcasted_iota(jnp.int32, (1, 1, HW), 2)
    pcol = lane % W
    col_ok = {dx: (pcol >= -dx) if dx < 0 else (pcol < W - dx)
              for dx in (-2, -1, 1, 2)}

    # ---- im2col slab (N, K=17*C, HW) in bf16: one store per tap ----
    for t, (dy, dx) in enumerate(_TAPS):
        off = dy * W + dx
        sh = xpad_ref[:, :, _PAD + off:_PAD + off + HW]          # (N, C, HW) f32
        if dx != 0:
            sh = jnp.where(col_ok[dx], sh, 0.0)                  # f32 select
        xcol_ref[:, t * C:(t + 1) * C, :] = sh.astype(xcol_ref.dtype)

    # ---- both convs: N small MXU matmuls (2C, K) @ (K, HW), f32 accumulate ----
    w = wconv_ref[...]                                           # (2C, K) bf16
    bias = bias_ref[...]                                         # (2C, 1) f32
    s1 = jnp.zeros((C2, 1), jnp.float32)
    s2 = jnp.zeros((C2, 1), jnp.float32)
    for n in range(N):
        yn = jnp.dot(w, xcol_ref[n],
                     preferred_element_type=jnp.float32) + bias  # (2C, HW) f32
        s1 = s1 + jnp.sum(yn, axis=1, keepdims=True)
        s2 = s2 + jnp.sum(yn * yn, axis=1, keepdims=True)
        ybuf_ref[n] = yn

    # ---- BatchNorm (training-mode batch stats, single pass) ----
    mean = s1 * (1.0 / M)
    var = s2 * (1.0 / M) - mean * mean                           # biased variance
    scale = gamma_ref[...] * jax.lax.rsqrt(var + BN_EPS)         # (2C, 1)
    shift = beta_ref[...] - mean * scale

    # ---- squeeze-excite attention from the ORIGINAL input (VPU only) ----
    gap = jnp.mean(x_ref[...], axis=2)                                   # (N, C)
    h = jnp.maximum(
        jnp.sum(gap[:, None, :] * fw1_ref[...][None], axis=2) + fb1_ref[...],
        0.0)                                                             # (N, Cr)
    logit = (jnp.sum(h[:, None, :] * fw2_ref[...][None], axis=2, keepdims=True)
             + fb2_ref[...][None])                                       # (N, C, 1)
    attn = jax.nn.sigmoid(logit)

    # ---- out = relu(relu(BN1) + relu(BN2) + x*attn), lane-dense NCHW ----
    for n in range(N):
        yn = ybuf_ref[n]                                         # (2C, HW) f32
        x1n = jnp.maximum(yn[0:C] * scale[0:C] + shift[0:C], 0.0)
        x2n = jnp.maximum(yn[C:C2] * scale[C:C2] + shift[C:C2], 0.0)
        out_ref[n] = jnp.maximum(x1n + x2n + x_ref[n] * attn[n],
                                 0.0).astype(out_ref.dtype)


def _prepare_params(p, C):
    """PyTorch-layout params -> kernel-layout (bf16 im2col weight, f32 vecs)."""
    tap_idx = {t: i for i, t in enumerate(_TAPS)}
    blocks = [jnp.zeros((2 * C, C), jnp.float32) for _ in _TAPS]
    for ky in range(3):
        for kx in range(3):
            t1 = tap_idx[(2 * ky - 2, 2 * kx - 2)]    # dilated conv1 tap
            blocks[t1] = blocks[t1].at[0:C, :].set(p['w1'][:, :, ky, kx])
            t2 = tap_idx[(ky - 1, kx - 1)]            # dense conv2 tap
            blocks[t2] = blocks[t2].at[C:2 * C, :].set(p['w2'][:, :, ky, kx])
    wconv = jnp.concatenate(blocks, axis=1).astype(jnp.bfloat16)  # (2C, 17*C)
    bias = jnp.concatenate([p['b1'], p['b2']])[:, None]           # (2C, 1) f32
    gamma = jnp.concatenate([p['g1'], p['g2']])[:, None]          # (2C, 1)
    beta = jnp.concatenate([p['be1'], p['be2']])[:, None]         # (2C, 1)
    fw1 = p['fw1'].astype(jnp.float32)                            # (Cr, C)
    fb1 = p['fb1'][None, :].astype(jnp.float32)                   # (1, Cr)
    fw2 = p['fw2'].astype(jnp.float32)                            # (C, Cr)
    fb2 = p['fb2'][:, None].astype(jnp.float32)                   # (C, 1)
    return (wconv, bias, gamma, beta, fw1, fb1, fw2, fb2)


def tblock_forward(x_nchw, p):
    """x_nchw: (N, C, H, W) float32, PyTorch layout."""
    N, C, H, W = x_nchw.shape
    HW = H * W
    K = len(_TAPS) * C
    # Layout assumptions -- fail loudly on unsupported shapes.
    assert 2 * W + 2 <= _PAD, "lane margin too small for this width"
    assert HW % 128 == 0, "H*W must be a multiple of 128 for lane-dense layout"
    assert C % 8 == 0, "C must be a multiple of 8 (sublane tile)"

    kp = _prepare_params(p, C)
    x3 = x_nchw.reshape(N, C, HW).astype(jnp.float32)   # free reshape, no copy

    vmem = pl.BlockSpec(memory_space=pltpu.MemorySpace.VMEM)
    out = pl.pallas_call(
        functools.partial(_tblock_kernel, W=W),
        out_shape=jax.ShapeDtypeStruct((N, C, HW), jnp.float32),
        in_specs=[vmem] * (1 + len(kp)),
        out_specs=vmem,
        scratch_shapes=[
            pltpu.VMEM((N, C, HW + 2 * _PAD), jnp.float32),   # flat padded x
            pltpu.VMEM((N, K, HW), jnp.bfloat16),             # im2col slab (bf16)
            pltpu.VMEM((N, 2 * C, HW), jnp.float32),          # pre-BN conv output
        ],
    )(x3, *kp)
    return out.reshape(N, C, H, W)                       # free reshape, no copy


def tblock_reference(x, p):
    """Pure-JAX reference with identical semantics (NCHW, f32 'gold' path)."""
    dn = ('NCHW', 'OIHW', 'NCHW')
    y1 = jax.lax.conv_general_dilated(
        x, p['w1'], window_strides=(1, 1), padding=((2, 2), (2, 2)),
        rhs_dilation=(2, 2), dimension_numbers=dn, precision=_HI)
    y1 = y1 + p['b1'][None, :, None, None]
    y2 = jax.lax.conv_general_dilated(
        x, p['w2'], window_strides=(1, 1), padding=((1, 1), (1, 1)),
        dimension_numbers=dn, precision=_HI)
    y2 = y2 + p['b2'][None, :, None, None]

    def bn(y, g, b):
        mean = jnp.mean(y, axis=(0, 2, 3), keepdims=True)
        var = jnp.mean((y - mean) ** 2, axis=(0, 2, 3), keepdims=True)
        return ((y - mean) * jax.lax.rsqrt(var + BN_EPS) * g[None, :, None, None]
                + b[None, :, None, None])

    x1 = jax.nn.relu(bn(y1, p['g1'], p['be1']))
    x2 = jax.nn.relu(bn(y2, p['g2'], p['be2']))
    gap = jnp.mean(x, axis=(2, 3))                                   # (N, C)
    h = jax.nn.relu(jnp.dot(gap, p['fw1'].T, precision=_HI) + p['fb1'])
    attn = jax.nn.sigmoid(jnp.dot(h, p['fw2'].T, precision=_HI) + p['fb2'])
    return jax.nn.relu(x1 + x2 + x * attn[:, :, None, None])


if __name__ == "__main__":
    N, C, H, W = 2, 16, 16, 16
    Cr = C // 8

    key = jax.random.PRNGKey(0)
    ks = jax.random.split(key, 12)

    def bf16r(a):
        # Pre-round to bf16-representable values so the kernel's default-precision
        # MXU path (bf16 multiplies, f32 accumulate) matches the f32 reference
        # tightly.  NOTE: with genuine f32 inputs the bf16 slab/weights diverge
        # from an f32 reference beyond 2e-3 (documented in the review).
        return a.astype(jnp.bfloat16).astype(jnp.float32)

    # Parameters in PyTorch-native layouts (Conv2d: OIHW, Linear: (out, in)).
    p = {
        'w1': bf16r(jax.random.normal(ks[0], (C, C, 3, 3), jnp.float32) * 0.08),
        'b1': jax.random.normal(ks[1], (C,), jnp.float32) * 0.05,
        'w2': bf16r(jax.random.normal(ks[2], (C, C, 3, 3), jnp.float32) * 0.08),
        'b2': jax.random.normal(ks[3], (C,), jnp.float32) * 0.05,
        'g1': 1.0 + 0.1 * jax.random.normal(ks[4], (C,), jnp.float32),
        'be1': 0.1 * jax.random.normal(ks[5], (C,), jnp.float32),
        'g2': 1.0 + 0.1 * jax.random.normal(ks[6], (C,), jnp.float32),
        'be2': 0.1 * jax.random.normal(ks[7], (C,), jnp.float32),
        'fw1': jax.random.normal(ks[8], (Cr, C), jnp.float32) * 0.25,
        'fb1': jax.random.normal(ks[9], (Cr,), jnp.float32) * 0.05,
        'fw2': jax.random.normal(ks[10], (C, Cr), jnp.float32) * 0.25,
        'fb2': jax.random.normal(ks[11], (C,), jnp.float32) * 0.05,
    }
    x = bf16r(jax.random.normal(jax.random.PRNGKey(1), (N, C, H, W), jnp.float32))

    out = jax.block_until_ready(jax.jit(tblock_forward)(x, p))
    ref = jax.block_until_ready(tblock_reference(x, p))

    assert out.shape == (N, C, H, W), out.shape
    err = float(jnp.max(jnp.abs(out - ref)))
    if not jnp.allclose(out, ref, atol=2e-3, rtol=2e-3):
        raise AssertionError(f"mismatch vs reference, max abs err = {err}")
    print("KERNEL_OK")
</pallas_src>

<mosaic_0001>
module attributes {stable_mosaic.version = 11 : i64} {
  func.func @_tblock_kernel(%arg0: memref<2x16x256xf32, #tpu.memory_space<vmem>>, %arg1: memref<32x272xbf16, #tpu.memory_space<vmem>>, %arg2: memref<32x1xf32, #tpu.memory_space<vmem>>, %arg3: memref<32x1xf32, #tpu.memory_space<vmem>>, %arg4: memref<32x1xf32, #tpu.memory_space<vmem>>, %arg5: memref<2x16xf32, #tpu.memory_space<vmem>>, %arg6: memref<1x2xf32, #tpu.memory_space<vmem>>, %arg7: memref<16x2xf32, #tpu.memory_space<vmem>>, %arg8: memref<16x1xf32, #tpu.memory_space<vmem>>, %arg9: memref<2x16x256xf32, #tpu.memory_space<vmem>>, %arg10: memref<2x16x512xf32, #tpu.memory_space<vmem>>, %arg11: memref<2x272x256xbf16, #tpu.memory_space<vmem>>, %arg12: memref<2x32x256xf32, #tpu.memory_space<vmem>>) attributes {dimension_semantics = [], scalar_prefetch = 0 : i64, scratch_operands = 3 : i64, tpu.core_type = #tpu.core_type<tc>} {
    %cst = arith.constant 0.000000e+00 : f32
    %0 = vector.broadcast %cst : f32 to vector<2x16x128xf32>
    %c0 = arith.constant 0 : index
    %c0_0 = arith.constant 0 : index
    %c0_1 = arith.constant 0 : index
    %1 = vector.load %arg10[%c0, %c0_0, %c0_1] : memref<2x16x512xf32, #tpu.memory_space<vmem>>, vector<2x16x128xf32>
    tpu.vector_store %arg10[%c0, %c0_0, %c0_1], %0 {strides = array<i32>} : memref<2x16x512xf32, #tpu.memory_space<vmem>>, vector<2x16x128xf32>,
    %cst_2 = arith.constant 0.000000e+00 : f32
    %2 = vector.broadcast %cst_2 : f32 to vector<2x16x128xf32>
    %c0_3 = arith.constant 0 : index
    %c0_4 = arith.constant 0 : index
    %c384 = arith.constant 384 : index
    %3 = vector.load %arg10[%c0_3, %c0_4, %c384] : memref<2x16x512xf32, #tpu.memory_space<vmem>>, vector<2x16x128xf32>
    tpu.vector_store %arg10[%c0_3, %c0_4, %c384], %2 {strides = array<i32>} : memref<2x16x512xf32, #tpu.memory_space<vmem>>, vector<2x16x128xf32>,
    %c0_5 = arith.constant 0 : index
    %c0_6 = arith.constant 0 : index
    %c0_7 = arith.constant 0 : index
    %4 = vector.load %arg0[%c0_5, %c0_6, %c0_7] : memref<2x16x256xf32, #tpu.memory_space<vmem>>, vector<2x16x256xf32>
    %c0_8 = arith.constant 0 : index
    %c0_9 = arith.constant 0 : index
    %c128 = arith.constant 128 : index
    %5 = vector.load %arg10[%c0_8, %c0_9, %c128] : memref<2x16x512xf32, #tpu.memory_space<vmem>>, vector<2x16x256xf32>
    tpu.vector_store %arg10[%c0_8, %c0_9, %c128], %4 {strides = array<i32>} : memref<2x16x512xf32, #tpu.memory_space<vmem>>, vector<2x16x256xf32>,
    %6 = tpu.iota {dimensions = array<i32: 2>} : vector<1x1x256xi32>
    %c16_i32 = arith.constant 16 : i32
    %c0_i32 = arith.constant 0 : i32
    %7 = arith.cmpi eq, %c16_i32, %c0_i32 : i32
    %c1_i32 = arith.constant 1 : i32
    %8 = arith.select %7, %c1_i32, %c16_i32 : i32
    %9 = vector.broadcast %8 : i32 to vector<1x1x256xi32>
    %10 = arith.remsi %6, %9 : vector<1x1x256xi32>
    %c0_i32_10 = arith.constant 0 : i32
    %11 = vector.broadcast %c0_i32_10 : i32 to vector<1x1x256xi32>
    %12 = arith.cmpi ne, %10, %11 : vector<1x1x256xi32>
    %c0_i32_11 = arith.constant 0 : i32
    %13 = vector.broadcast %c0_i32_11 : i32 to vector<1x1x256xi32>
    %14 = arith.cmpi slt, %10, %13 : vector<1x1x256xi32>
    %c0_i32_12 = arith.constant 0 : i32
    %15 = arith.cmpi slt, %8, %c0_i32_12 : i32
    %16 = vector.broadcast %15 : i1 to vector<1x1x256xi1>
    %17 = vector.broadcast %16 : vector<1x1x256xi1> to vector<1x1x256xi1>
    %18 = arith.xori %14, %17 : vector<1x1x256xi1>
    %19 = arith.andi %18, %12 : vector<1x1x256xi1>
    %20 = vector.broadcast %8 : i32 to vector<1x1x256xi32>
    %21 = arith.addi %10, %20 : vector<1x1x256xi32>
    %22 = arith.select %19, %21, %10 : vector<1x1x256xi1>, vector<1x1x256xi32>
    %c2_i32 = arith.constant 2 : i32
    %23 = vector.broadcast %c2_i32 : i32 to vector<1x1x256xi32>
    %24 = arith.cmpi sge, %22, %23 : vector<1x1x256xi32>
    %c1_i32_13 = arith.constant 1 : i32
    %25 = vector.broadcast %c1_i32_13 : i32 to vector<1x1x256xi32>
    %26 = arith.cmpi sge, %22, %25 : vector<1x1x256xi32>
    %c15_i32 = arith.constant 15 : i32
    %27 = vector.broadcast %c15_i32 : i32 to vector<1x1x256xi32>
    %28 = arith.cmpi slt, %22, %27 : vector<1x1x256xi32>
    %c14_i32 = arith.constant 14 : i32
    %29 = vector.broadcast %c14_i32 : i32 to vector<1x1x256xi32>
    %30 = arith.cmpi slt, %22, %29 : vector<1x1x256xi32>
    %c0_14 = arith.constant 0 : index
    %c0_15 = arith.constant 0 : index
    %c94 = arith.constant 94 : index
    %31 = vector.load %arg10[%c0_14, %c0_15, %c94] : memref<2x16x512xf32, #tpu.memory_space<vmem>>, vector<2x16x256xf32>
    %cst_16 = arith.constant 0.000000e+00 : f32
    %32 = vector.shape_cast %24 : vector<1x1x256xi1> to vector<1x1x256xi1>
    %33 = vector.broadcast %32 : vector<1x1x256xi1> to vector<2x16x256xi1>
    %34 = vector.broadcast %cst_16 : f32 to vector<2x16x256xf32>
    %35 = arith.select %33, %31, %34 : vector<2x16x256xi1>, vector<2x16x256xf32>
    %36 = arith.truncf %35 : vector<2x16x256xf32> to vector<2x16x256xbf16>
    %c0_17 = arith.constant 0 : index
    %c0_18 = arith.constant 0 : index
    %c0_19 = arith.constant 0 : index
    %37 = vector.load %arg11[%c0_17, %c0_18, %c0_19] : memref<2x272x256xbf16, #tpu.memory_space<vmem>>, vector<2x16x256xbf16>
    tpu.vector_store %arg11[%c0_17, %c0_18, %c0_19], %36 {strides = array<i32>} : memref<2x272x256xbf16, #tpu.memory_space<vmem>>, vector<2x16x256xbf16>,
    %c0_20 = arith.constant 0 : index
    %c0_21 = arith.constant 0 : index
    %c96 = arith.constant 96 : index
    %38 = vector.load %arg10[%c0_20, %c0_21, %c96] : memref<2x16x512xf32, #tpu.memory_space<vmem>>, vector<2x16x256xf32>
    %39 = arith.truncf %38 : vector<2x16x256xf32> to vector<2x16x256xbf16>
    %c0_22 = arith.constant 0 : index
    %c16 = arith.constant 16 : index
    %c0_23 = arith.constant 0 : index
    %40 = vector.load %arg11[%c0_22, %c16, %c0_23] : memref<2x272x256xbf16, #tpu.memory_space<vmem>>, vector<2x16x256xbf16>
    tpu.vector_store %arg11[%c0_22, %c16, %c0_23], %39 {strides = array<i32>} : memref<2x272x256xbf16, #tpu.memory_space<vmem>>, vector<2x16x256xbf16>,
    %c0_24 = arith.constant 0 : index
    %c0_25 = arith.constant 0 : index
    %c98 = arith.constant 98 : index
    %41 = vector.load %arg10[%c0_24, %c0_25, %c98] : memref<2x16x512xf32, #tpu.memory_space<vmem>>, vector<2x16x256xf32>
    %cst_26 = arith.constant 0.000000e+00 : f32
    %42 = vector.shape_cast %30 : vector<1x1x256xi1> to vector<1x1x256xi1>
    %43 = vector.broadcast %42 : vector<1x1x256xi1> to vector<2x16x256xi1>
    %44 = vector.broadcast %cst_26 : f32 to vector<2x16x256xf32>
    %45 = arith.select %43, %41, %44 : vector<2x16x256xi1>, vector<2x16x256xf32>
    %46 = arith.truncf %45 : vector<2x16x256xf32> to vector<2x16x256xbf16>
    %c0_27 = arith.constant 0 : index
    %c32 = arith.constant 32 : index
    %c0_28 = arith.constant 0 : index
    %47 = vector.load %arg11[%c0_27, %c32, %c0_28] : memref<2x272x256xbf16, #tpu.memory_space<vmem>>, vector<2x16x256xbf16>
    tpu.vector_store %arg11[%c0_27, %c32, %c0_28], %46 {strides = array<i32>} : memref<2x272x256xbf16, #tpu.memory_space<vmem>>, vector<2x16x256xbf16>,
    %c0_29 = arith.constant 0 : index
    %c0_30 = arith.constant 0 : index
    %c111 = arith.constant 111 : index
    %48 = vector.load %arg10[%c0_29, %c0_30, %c111] : memref<2x16x512xf32, #tpu.memory_space<vmem>>, vector<2x16x256xf32>
    %cst_31 = arith.constant 0.000000e+00 : f32
    %49 = vector.shape_cast %26 : vector<1x1x256xi1> to vector<1x1x256xi1>
    %50 = vector.broadcast %49 : vector<1x1x256xi1> to vector<2x16x256xi1>
    %51 = vector.broadcast %cst_31 : f32 to vector<2x16x256xf32>
    %52 = arith.select %50, %48, %51 : vector<2x16x256xi1>, vector<2x16x256xf32>
    %53 = arith.truncf %52 : vector<2x16x256xf32> to vector<2x16x256xbf16>
    %c0_32 = arith.constant 0 : index
    %c48 = arith.constant 48 : index
    %c0_33 = arith.constant 0 : index
    %54 = vector.load %arg11[%c0_32, %c48, %c0_33] : memref<2x272x256xbf16, #tpu.memory_space<vmem>>, vector<2x16x256xbf16>
    tpu.vector_store %arg11[%c0_32, %c48, %c0_33], %53 {strides = array<i32>} : memref<2x272x256xbf16, #tpu.memory_space<vmem>>, vector<2x16x256xbf16>,
    %c0_34 = arith.constant 0 : index
    %c0_35 = arith.constant 0 : index
    %c112 = arith.constant 112 : index
    %55 = vector.load %arg10[%c0_34, %c0_35, %c112] : memref<2x16x512xf32, #tpu.memory_space<vmem>>, vector<2x16x256xf32>
    %56 = arith.truncf %55 : vector<2x16x256xf32> to vector<2x16x256xbf16>
    %c0_36 = arith.constant 0 : index
    %c64 = arith.constant 64 : index
    %c0_37 = arith.constant 0 : index
    %57 = vector.load %arg11[%c0_36, %c64, %c0_37] : memref<2x272x256xbf16, #tpu.memory_space<vmem>>, vector<2x16x256xbf16>
    tpu.vector_store %arg11[%c0_36, %c64, %c0_37], %56 {strides = array<i32>} : memref<2x272x256xbf16, #tpu.memory_space<vmem>>, vector<2x16x256xbf16>,
    %c0_38 = arith.constant 0 : index
    %c0_39 = arith.constant 0 : index
    %c113 = arith.constant 113 : index
    %58 = vector.load %arg10[%c0_38, %c0_39, %c113] : memref<2x16x512xf32, #tpu.memory_space<vmem>>, vector<2x16x256xf32>
    %cst_40 = arith.constant 0.000000e+00 : f32
    %59 = vector.shape_cast %28 : vector<1x1x256xi1> to vector<1x1x256xi1>
    %60 = vector.broadcast %59 : vector<1x1x256xi1> to vector<2x16x256xi1>
    %61 = vector.broadcast %cst_40 : f32 to vector<2x16x256xf32>
    %62 = arith.select %60, %58, %61 : vector<2x16x256xi1>, vector<2x16x256xf32>
    %63 = arith.truncf %62 : vector<2x16x256xf32> to vector<2x16x256xbf16>
    %c0_41 = arith.constant 0 : index
    %c80 = arith.constant 80 : index
    %c0_42 = arith.constant 0 : index
    %64 = vector.load %arg11[%c0_41, %c80, %c0_42] : memref<2x272x256xbf16, #tpu.memory_space<vmem>>, vector<2x16x256xbf16>
    tpu.vector_store %arg11[%c0_41, %c80, %c0_42], %63 {strides = array<i32>} : memref<2x272x256xbf16, #tpu.memory_space<vmem>>, vector<2x16x256xbf16>,
    %c0_43 = arith.constant 0 : index
    %c0_44 = arith.constant 0 : index
    %c126 = arith.constant 126 : index
    %65 = vector.load %arg10[%c0_43, %c0_44, %c126] : memref<2x16x512xf32, #tpu.memory_space<vmem>>, vector<2x16x256xf32>
    %cst_45 = arith.constant 0.000000e+00 : f32
    %66 = vector.shape_cast %24 : vector<1x1x256xi1> to vector<1x1x256xi1>
    %67 = vector.broadcast %66 : vector<1x1x256xi1> to vector<2x16x256xi1>
    %68 = vector.broadcast %cst_45 : f32 to vector<2x16x256xf32>
    %69 = arith.select %67, %65, %68 : vector<2x16x256xi1>, vector<2x16x256xf32>
    %70 = arith.truncf %69 : vector<2x16x256xf32> to vector<2x16x256xbf16>
    %c0_46 = arith.constant 0 : index
    %c96_47 = arith.constant 96 : index
    %c0_48 = arith.constant 0 : index
    %71 = vector.load %arg11[%c0_46, %c96_47, %c0_48] : memref<2x272x256xbf16, #tpu.memory_space<vmem>>, vector<2x16x256xbf16>
    tpu.vector_store %arg11[%c0_46, %c96_47, %c0_48], %70 {strides = array<i32>} : memref<2x272x256xbf16, #tpu.memory_space<vmem>>, vector<2x16x256xbf16>,
    %c0_49 = arith.constant 0 : index
    %c0_50 = arith.constant 0 : index
    %c127 = arith.constant 127 : index
    %72 = vector.load %arg10[%c0_49, %c0_50, %c127] : memref<2x16x512xf32, #tpu.memory_space<vmem>>, vector<2x16x256xf32>
    %cst_51 = arith.constant 0.000000e+00 : f32
    %73 = vector.shape_cast %26 : vector<1x1x256xi1> to vector<1x1x256xi1>
    %74 = vector.broadcast %73 : vector<1x1x256xi1> to vector<2x16x256xi1>
    %75 = vector.broadcast %cst_51 : f32 to vector<2x16x256xf32>
    %76 = arith.select %74, %72, %75 : vector<2x16x256xi1>, vector<2x16x256xf32>
    %77 = arith.truncf %76 : vector<2x16x256xf32> to vector<2x16x256xbf16>
    %c0_52 = arith.constant 0 : index
    %c112_53 = arith.constant 112 : index
    %c0_54 = arith.constant 0 : index
    %78 = vector.load %arg11[%c0_52, %c112_53, %c0_54] : memref<2x272x256xbf16, #tpu.memory_space<vmem>>, vector<2x16x256xbf16>
    tpu.vector_store %arg11[%c0_52, %c112_53, %c0_54], %77 {strides = array<i32>} : memref<2x272x256xbf16, #tpu.memory_space<vmem>>, vector<2x16x256xbf16>,
    %c0_55 = arith.constant 0 : index
    %c0_56 = arith.constant 0 : index
    %c128_57 = arith.constant 128 : index
    %79 = vector.load %arg10[%c0_55, %c0_56, %c128_57] : memref<2x16x512xf32, #tpu.memory_space<vmem>>, vector<2x16x256xf32>
    %80 = arith.truncf %79 : vector<2x16x256xf32> to vector<2x16x256xbf16>
    %c0_58 = arith.constant 0 : index
    %c128_59 = arith.constant 128 : index
    %c0_60 = arith.constant 0 : index
    %81 = vector.load %arg11[%c0_58, %c128_59, %c0_60] : memref<2x272x256xbf16, #tpu.memory_space<vmem>>, vector<2x16x256xbf16>
    tpu.vector_store %arg11[%c0_58, %c128_59, %c0_60], %80 {strides = array<i32>} : memref<2x272x256xbf16, #tpu.memory_space<vmem>>, vector<2x16x256xbf16>,
    %c0_61 = arith.constant 0 : index
    %c0_62 = arith.constant 0 : index
    %c129 = arith.constant 129 : index
    %82 = vector.load %arg10[%c0_61, %c0_62, %c129] : memref<2x16x512xf32, #tpu.memory_space<vmem>>, vector<2x16x256xf32>
    %cst_63 = arith.constant 0.000000e+00 : f32
    %83 = vector.shape_cast %28 : vector<1x1x256xi1> to vector<1x1x256xi1>
    %84 = vector.broadcast %83 : vector<1x1x256xi1> to vector<2x16x256xi1>
    %85 = vector.broadcast %cst_63 : f32 to vector<2x16x256xf32>
    %86 = arith.select %84, %82, %85 : vector<2x16x256xi1>, vector<2x16x256xf32>
    %87 = arith.truncf %86 : vector<2x16x256xf32> to vector<2x16x256xbf16>
    %c0_64 = arith.constant 0 : index
    %c144 = arith.constant 144 : index
    %c0_65 = arith.constant 0 : index
    %88 = vector.load %arg11[%c0_64, %c144, %c0_65] : memref<2x272x256xbf16, #tpu.memory_space<vmem>>, vector<2x16x256xbf16>
    tpu.vector_store %arg11[%c0_64, %c144, %c0_65], %87 {strides = array<i32>} : memref<2x272x256xbf16, #tpu.memory_space<vmem>>, vector<2x16x256xbf16>,
    %c0_66 = arith.constant 0 : index
    %c0_67 = arith.constant 0 : index
    %c130 = arith.constant 130 : index
    %89 = vector.load %arg10[%c0_66, %c0_67, %c130] : memref<2x16x512xf32, #tpu.memory_space<vmem>>, vector<2x16x256xf32>
    %cst_68 = arith.constant 0.000000e+00 : f32
    %90 = vector.shape_cast %30 : vector<1x1x256xi1> to vector<1x1x256xi1>
    %91 = vector.broadcast %90 : vector<1x1x256xi1> to vector<2x16x256xi1>
    %92 = vector.broadcast %cst_68 : f32 to vector<2x16x256xf32>
    %93 = arith.select %91, %89, %92 : vector<2x16x256xi1>, vector<2x16x256xf32>
    %94 = arith.truncf %93 : vector<2x16x256xf32> to vector<2x16x256xbf16>
    %c0_69 = arith.constant 0 : index
    %c160 = arith.constant 160 : index
    %c0_70 = arith.constant 0 : index
    %95 = vector.load %arg11[%c0_69, %c160, %c0_70] : memref<2x272x256xbf16, #tpu.memory_space<vmem>>, vector<2x16x256xbf16>
    tpu.vector_store %arg11[%c0_69, %c160, %c0_70], %94 {strides = array<i32>} : memref<2x272x256xbf16, #tpu.memory_space<vmem>>, vector<2x16x256xbf16>,
    %c0_71 = arith.constant 0 : index
    %c0_72 = arith.constant 0 : index
    %c143 = arith.constant 143 : index
    %96 = vector.load %arg10[%c0_71, %c0_72, %c143] : memref<2x16x512xf32, #tpu.memory_space<vmem>>, vector<2x16x256xf32>
    %cst_73 = arith.constant 0.000000e+00 : f32
    %97 = vector.shape_cast %26 : vector<1x1x256xi1> to vector<1x1x256xi1>
    %98 = vector.broadcast %97 : vector<1x1x256xi1> to vector<2x16x256xi1>
    %99 = vector.broadcast %cst_73 : f32 to vector<2x16x256xf32>
    %100 = arith.select %98, %96, %99 : vector<2x16x256xi1>, vector<2x16x256xf32>
    %101 = arith.truncf %100 : vector<2x16x256xf32> to vector<2x16x256xbf16>
    %c0_74 = arith.constant 0 : index
    %c176 = arith.constant 176 : index
    %c0_75 = arith.constant 0 : index
    %102 = vector.load %arg11[%c0_74, %c176, %c0_75] : memref<2x272x256xbf16, #tpu.memory_space<vmem>>, vector<2x16x256xbf16>
    tpu.vector_store %arg11[%c0_74, %c176, %c0_75], %101 {strides = array<i32>} : memref<2x272x256xbf16, #tpu.memory_space<vmem>>, vector<2x16x256xbf16>,
    %c0_76 = arith.constant 0 : index
    %c0_77 = arith.constant 0 : index
    %c144_78 = arith.constant 144 : index
    %103 = vector.load %arg10[%c0_76, %c0_77, %c144_78] : memref<2x16x512xf32, #tpu.memory_space<vmem>>, vector<2x16x256xf32>
    %104 = arith.truncf %103 : vector<2x16x256xf32> to vector<2x16x256xbf16>
    %c0_79 = arith.constant 0 : index
    %c192 = arith.constant 192 : index
    %c0_80 = arith.constant 0 : index
    %105 = vector.load %arg11[%c0_79, %c192, %c0_80] : memref<2x272x256xbf16, #tpu.memory_space<vmem>>, vector<2x16x256xbf16>
    tpu.vector_store %arg11[%c0_79, %c192, %c0_80], %104 {strides = array<i32>} : memref<2x272x256xbf16, #tpu.memory_space<vmem>>, vector<2x16x256xbf16>,
    %c0_81 = arith.constant 0 : index
    %c0_82 = arith.constant 0 : index
    %c145 = arith.constant 145 : index
    %106 = vector.load %arg10[%c0_81, %c0_82, %c145] : memref<2x16x512xf32, #tpu.memory_space<vmem>>, vector<2x16x256xf32>
    %cst_83 = arith.constant 0.000000e+00 : f32
    %107 = vector.shape_cast %28 : vector<1x1x256xi1> to vector<1x1x256xi1>
    %108 = vector.broadcast %107 : vector<1x1x256xi1> to vector<2x16x256xi1>
    %109 = vector.broadcast %cst_83 : f32 to vector<2x16x256xf32>
    %110 = arith.select %108, %106, %109 : vector<2x16x256xi1>, vector<2x16x256xf32>
    %111 = arith.truncf %110 : vector<2x16x256xf32> to vector<2x16x256xbf16>
    %c0_84 = arith.constant 0 : index
    %c208 = arith.constant 208 : index
    %c0_85 = arith.constant 0 : index
    %112 = vector.load %arg11[%c0_84, %c208, %c0_85] : memref<2x272x256xbf16, #tpu.memory_space<vmem>>, vector<2x16x256xbf16>
    tpu.vector_store %arg11[%c0_84, %c208, %c0_85], %111 {strides = array<i32>} : memref<2x272x256xbf16, #tpu.memory_space<vmem>>, vector<2x16x256xbf16>,
    %c0_86 = arith.constant 0 : index
    %c0_87 = arith.constant 0 : index
    %c158 = arith.constant 158 : index
    %113 = vector.load %arg10[%c0_86, %c0_87, %c158] : memref<2x16x512xf32, #tpu.memory_space<vmem>>, vector<2x16x256xf32>
    %cst_88 = arith.constant 0.000000e+00 : f32
    %114 = vector.shape_cast %24 : vector<1x1x256xi1> to vector<1x1x256xi1>
    %115 = vector.broadcast %114 : vector<1x1x256xi1> to vector<2x16x256xi1>
    %116 = vector.broadcast %cst_88 : f32 to vector<2x16x256xf32>
    %117 = arith.select %115, %113, %116 : vector<2x16x256xi1>, vector<2x16x256xf32>
    %118 = arith.truncf %117 : vector<2x16x256xf32> to vector<2x16x256xbf16>
    %c0_89 = arith.constant 0 : index
    %c224 = arith.constant 224 : index
    %c0_90 = arith.constant 0 : index
    %119 = vector.load %arg11[%c0_89, %c224, %c0_90] : memref<2x272x256xbf16, #tpu.memory_space<vmem>>, vector<2x16x256xbf16>
    tpu.vector_store %arg11[%c0_89, %c224, %c0_90], %118 {strides = array<i32>} : memref<2x272x256xbf16, #tpu.memory_space<vmem>>, vector<2x16x256xbf16>,
    %c0_91 = arith.constant 0 : index
    %c0_92 = arith.constant 0 : index
    %c160_93 = arith.constant 160 : index
    %120 = vector.load %arg10[%c0_91, %c0_92, %c160_93] : memref<2x16x512xf32, #tpu.memory_space<vmem>>, vector<2x16x256xf32>
    %121 = arith.truncf %120 : vector<2x16x256xf32> to vector<2x16x256xbf16>
    %c0_94 = arith.constant 0 : index
    %c240 = arith.constant 240 : index
    %c0_95 = arith.constant 0 : index
    %122 = vector.load %arg11[%c0_94, %c240, %c0_95] : memref<2x272x256xbf16, #tpu.memory_space<vmem>>, vector<2x16x256xbf16>
    tpu.vector_store %arg11[%c0_94, %c240, %c0_95], %121 {strides = array<i32>} : memref<2x272x256xbf16, #tpu.memory_space<vmem>>, vector<2x16x256xbf16>,
    %c0_96 = arith.constant 0 : index
    %c0_97 = arith.constant 0 : index
    %c162 = arith.constant 162 : index
    %123 = vector.load %arg10[%c0_96, %c0_97, %c162] : memref<2x16x512xf32, #tpu.memory_space<vmem>>, vector<2x16x256xf32>
    %cst_98 = arith.constant 0.000000e+00 : f32
    %124 = vector.shape_cast %30 : vector<1x1x256xi1> to vector<1x1x256xi1>
    %125 = vector.broadcast %124 : vector<1x1x256xi1> to vector<2x16x256xi1>
    %126 = vector.broadcast %cst_98 : f32 to vector<2x16x256xf32>
    %127 = arith.select %125, %123, %126 : vector<2x16x256xi1>, vector<2x16x256xf32>
    %128 = arith.truncf %127 : vector<2x16x256xf32> to vector<2x16x256xbf16>
    %c0_99 = arith.constant 0 : index
    %c256 = arith.constant 256 : index
    %c0_100 = arith.constant 0 : index
    %129 = vector.load %arg11[%c0_99, %c256, %c0_100] : memref<2x272x256xbf16, #tpu.memory_space<vmem>>, vector<2x16x256xbf16>
    tpu.vector_store %arg11[%c0_99, %c256, %c0_100], %128 {strides = array<i32>} : memref<2x272x256xbf16, #tpu.memory_space<vmem>>, vector<2x16x256xbf16>,
    %c0_101 = arith.constant 0 : index
    %c0_102 = arith.constant 0 : index
    %130 = vector.load %arg1[%c0_101, %c0_102] : memref<32x272xbf16, #tpu.memory_space<vmem>>, vector<32x272xbf16>
    %c0_103 = arith.constant 0 : index
    %c0_104 = arith.constant 0 : index
    %131 = vector.load %arg2[%c0_103, %c0_104] : memref<32x1xf32, #tpu.memory_space<vmem>>, vector<32x1xf32>
    %cst_105 = arith.constant 0.000000e+00 : f32
    %132 = vector.broadcast %cst_105 : f32 to vector<32x1xf32>
    %cst_106 = arith.constant 0.000000e+00 : f32
    %133 = vector.broadcast %cst_106 : f32 to vector<32x1xf32>
    %c0_107 = arith.constant 0 : index
    %c0_108 = arith.constant 0 : index
    %c0_109 = arith.constant 0 : index
    %134 = vector.load %arg11[%c0_107, %c0_108, %c0_109] : memref<2x272x256xbf16, #tpu.memory_space<vmem>>, vector<1x272x256xbf16>
    %135 = vector.shape_cast %134 : vector<1x272x256xbf16> to vector<272x256xbf16>
    %cst_110 = arith.constant dense<0.000000e+00> : vector<32x256xf32>
    %136 = tpu.matmul %130, %135, %cst_110 {dimension_numbers = #tpu.dot_dimension_numbers<[1], [0], [0], [1], [0, 0, 1, 1], [], []>} : vector<32x272xbf16>, vector<272x256xbf16>, vector<32x256xf32> -> vector<32x256xf32>
    %137 = vector.broadcast %131 : vector<32x1xf32> to vector<32x256xf32>
    %138 = arith.addf %136, %137 : vector<32x256xf32>
    %cst_111 = arith.constant dense<0.000000e+00> : vector<32xf32>
    %139 = vector.multi_reduction <add>, %138, %cst_111 [1] : vector<32x256xf32> to vector<32xf32>
    %140 = vector.shape_cast %139 : vector<32xf32> to vector<32x1xf32>
    %141 = arith.addf %132, %140 : vector<32x1xf32>
    %142 = arith.mulf %138, %138 : vector<32x256xf32>
    %cst_112 = arith.constant dense<0.000000e+00> : vector<32xf32>
    %143 = vector.multi_reduction <add>, %142, %cst_112 [1] : vector<32x256xf32> to vector<32xf32>
    %144 = vector.shape_cast %143 : vector<32xf32> to vector<32x1xf32>
    %145 = arith.addf %133, %144 : vector<32x1xf32>
    %c0_113 = arith.constant 0 : index
    %c0_114 = arith.constant 0 : index
    %c0_115 = arith.constant 0 : index
    %146 = vector.load %arg12[%c0_113, %c0_114, %c0_115] : memref<2x32x256xf32, #tpu.memory_space<vmem>>, vector<1x32x256xf32>
    %147 = vector.shape_cast %146 : vector<1x32x256xf32> to vector<32x256xf32>
    %148 = vector.shape_cast %138 : vector<32x256xf32> to vector<1x32x256xf32>
    tpu.vector_store %arg12[%c0_113, %c0_114, %c0_115], %148 {strides = array<i32>} : memref<2x32x256xf32, #tpu.memory_space<vmem>>, vector<1x32x256xf32>,
    %c1 = arith.constant 1 : index
    %c0_116 = arith.constant 0 : index
    %c0_117 = arith.constant 0 : index
    %149 = vector.load %arg11[%c1, %c0_116, %c0_117] : memref<2x272x256xbf16, #tpu.memory_space<vmem>>, vector<1x272x256xbf16>
    %150 = vector.shape_cast %149 : vector<1x272x256xbf16> to vector<272x256xbf16>
    %cst_118 = arith.constant dense<0.000000e+00> : vector<32x256xf32>
    %151 = tpu.matmul %130, %150, %cst_118 {dimension_numbers = #tpu.dot_dimension_numbers<[1], [0], [0], [1], [0, 0, 1, 1], [], []>} : vector<32x272xbf16>, vector<272x256xbf16>, vector<32x256xf32> -> vector<32x256xf32>
    %152 = vector.broadcast %131 : vector<32x1xf32> to vector<32x256xf32>
    %153 = arith.addf %151, %152 : vector<32x256xf32>
    %cst_119 = arith.constant dense<0.000000e+00> : vector<32xf32>
    %154 = vector.multi_reduction <add>, %153, %cst_119 [1] : vector<32x256xf32> to vector<32xf32>
    %155 = vector.shape_cast %154 : vector<32xf32> to vector<32x1xf32>
    %156 = arith.addf %141, %155 : vector<32x1xf32>
    %157 = arith.mulf %153, %153 : vector<32x256xf32>
    %cst_120 = arith.constant dense<0.000000e+00> : vector<32xf32>
    %158 = vector.multi_reduction <add>, %157, %cst_120 [1] : vector<32x256xf32> to vector<32xf32>
    %159 = vector.shape_cast %158 : vector<32xf32> to vector<32x1xf32>
    %160 = arith.addf %145, %159 : vector<32x1xf32>
    %c1_121 = arith.constant 1 : index
    %c0_122 = arith.constant 0 : index
    %c0_123 = arith.constant 0 : index
    %161 = vector.load %arg12[%c1_121, %c0_122, %c0_123] : memref<2x32x256xf32, #tpu.memory_space<vmem>>, vector<1x32x256xf32>
    %162 = vector.shape_cast %161 : vector<1x32x256xf32> to vector<32x256xf32>
    %163 = vector.shape_cast %153 : vector<32x256xf32> to vector<1x32x256xf32>
    tpu.vector_store %arg12[%c1_121, %c0_122, %c0_123], %163 {strides = array<i32>} : memref<2x32x256xf32, #tpu.memory_space<vmem>>, vector<1x32x256xf32>,
    %cst_124 = arith.constant 0.001953125 : f32
    %164 = vector.broadcast %cst_124 : f32 to vector<32x1xf32>
    %165 = arith.mulf %156, %164 : vector<32x1xf32>
    %cst_125 = arith.constant 0.001953125 : f32
    %166 = vector.broadcast %cst_125 : f32 to vector<32x1xf32>
    %167 = arith.mulf %160, %166 : vector<32x1xf32>
    %168 = arith.mulf %165, %165 : vector<32x1xf32>
    %169 = arith.subf %167, %168 : vector<32x1xf32>
    %c0_126 = arith.constant 0 : index
    %c0_127 = arith.constant 0 : index
    %170 = vector.load %arg3[%c0_126, %c0_127] : memref<32x1xf32, #tpu.memory_space<vmem>>, vector<32x1xf32>
    %cst_128 = arith.constant 9.99999974E-6 : f32
    %171 = vector.broadcast %cst_128 : f32 to vector<32x1xf32>
    %172 = arith.addf %169, %171 : vector<32x1xf32>
    %173 = math.rsqrt %172 : vector<32x1xf32>
    %174 = arith.mulf %170, %173 : vector<32x1xf32>
    %c0_129 = arith.constant 0 : index
    %c0_130 = arith.constant 0 : index
    %175 = vector.load %arg4[%c0_129, %c0_130] : memref<32x1xf32, #tpu.memory_space<vmem>>, vector<32x1xf32>
    %176 = arith.mulf %165, %174 : vector<32x1xf32>
    %177 = arith.subf %175, %176 : vector<32x1xf32>
    %c0_131 = arith.constant 0 : index
    %c0_132 = arith.constant 0 : index
    %c0_133 = arith.constant 0 : index
    %178 = vector.load %arg0[%c0_131, %c0_132, %c0_133] : memref<2x16x256xf32, #tpu.memory_space<vmem>>, vector<2x16x256xf32>
    %cst_134 = arith.constant dense<0.000000e+00> : vector<2x16xf32>
    %179 = vector.multi_reduction <add>, %178, %cst_134 [2] : vector<2x16x256xf32> to vector<2x16xf32>
    %cst_135 = arith.constant 2.560000e+02 : f32
    %180 = vector.broadcast %cst_135 : f32 to vector<2x16xf32>
    %181 = arith.divf %179, %180 : vector<2x16xf32>
    %182 = vector.shape_cast %181 : vector<2x16xf32> to vector<2x1x16xf32>
    %c0_136 = arith.constant 0 : index
    %c0_137 = arith.constant 0 : index
    %183 = vector.load %arg5[%c0_136, %c0_137] : memref<2x16xf32, #tpu.memory_space<vmem>>, vector<2x16xf32>
    %184 = vector.shape_cast %183 : vector<2x16xf32> to vector<1x2x16xf32>
    %185 = vector.broadcast %182 : vector<2x1x16xf32> to vector<2x2x16xf32>
    %186 = vector.broadcast %184 : vector<1x2x16xf32> to vector<2x2x16xf32>
    %187 = arith.mulf %185, %186 : vector<2x2x16xf32>
    %cst_138 = arith.constant dense<0.000000e+00> : vector<2x2xf32>
    %188 = vector.multi_reduction <add>, %187, %cst_138 [2] : vector<2x2x16xf32> to vector<2x2xf32>
    %c0_139 = arith.constant 0 : index
    %c0_140 = arith.constant 0 : index
    %189 = vector.load %arg6[%c0_139, %c0_140] : memref<1x2xf32, #tpu.memory_space<vmem>>, vector<1x2xf32>
    %190 = vector.broadcast %189 : vector<1x2xf32> to vector<2x2xf32>
    %191 = arith.addf %188, %190 : vector<2x2xf32>
    %cst_141 = arith.constant 0.000000e+00 : f32
    %192 = vector.broadcast %cst_141 : f32 to vector<2x2xf32>
    %193 = arith.maximumf %191, %192 : vector<2x2xf32>
    %194 = vector.shape_cast %193 : vector<2x2xf32> to vector<2x1x2xf32>
    %c0_142 = arith.constant 0 : index
    %c0_143 = arith.constant 0 : index
    %195 = vector.load %arg7[%c0_142, %c0_143] : memref<16x2xf32, #tpu.memory_space<vmem>>, vector<16x2xf32>
    %196 = vector.shape_cast %195 : vector<16x2xf32> to vector<1x16x2xf32>
    %197 = vector.broadcast %194 : vector<2x1x2xf32> to vector<2x16x2xf32>
    %198 = vector.broadcast %196 : vector<1x16x2xf32> to vector<2x16x2xf32>
    %199 = arith.mulf %197, %198 : vector<2x16x2xf32>
    %cst_144 = arith.constant dense<0.000000e+00> : vector<2x16xf32>
    %200 = vector.multi_reduction <add>, %199, %cst_144 [2] : vector<2x16x2xf32> to vector<2x16xf32>
    %201 = vector.shape_cast %200 : vector<2x16xf32> to vector<2x16x1xf32>
    %c0_145 = arith.constant 0 : index
    %c0_146 = arith.constant 0 : index
    %202 = vector.load %arg8[%c0_145, %c0_146] : memref<16x1xf32, #tpu.memory_space<vmem>>, vector<16x1xf32>
    %203 = vector.shape_cast %202 : vector<16x1xf32> to vector<1x16x1xf32>
    %204 = vector.broadcast %203 : vector<1x16x1xf32> to vector<2x16x1xf32>
    %205 = arith.addf %201, %204 : vector<2x16x1xf32>
    %206 = arith.negf %205 : vector<2x16x1xf32>
    %207 = math.exp %206 : vector<2x16x1xf32>
    %cst_147 = arith.constant 1.000000e+00 : f32
    %208 = vector.broadcast %cst_147 : f32 to vector<2x16x1xf32>
    %209 = arith.addf %208, %207 : vector<2x16x1xf32>
    %210 = arith.divf %208, %209 : vector<2x16x1xf32>
    %c0_148 = arith.constant 0 : index
    %c0_149 = arith.constant 0 : index
    %c0_150 = arith.constant 0 : index
    %211 = vector.load %arg12[%c0_148, %c0_149, %c0_150] : memref<2x32x256xf32, #tpu.memory_space<vmem>>, vector<1x32x256xf32>
    %212 = vector.shape_cast %211 : vector<1x32x256xf32> to vector<32x256xf32>
    %213 = vector.extract_strided_slice %212 {offsets = [0, 0], sizes = [16, 256], strides = [1, 1]} : vector<32x256xf32> to vector<16x256xf32>
    %214 = vector.extract_strided_slice %174 {offsets = [0, 0], sizes = [16, 1], strides = [1, 1]} : vector<32x1xf32> to vector<16x1xf32>
    %215 = vector.broadcast %214 : vector<16x1xf32> to vector<16x256xf32>
    %216 = arith.mulf %213, %215 : vector<16x256xf32>
    %217 = vector.extract_strided_slice %177 {offsets = [0, 0], sizes = [16, 1], strides = [1, 1]} : vector<32x1xf32> to vector<16x1xf32>
    %218 = vector.broadcast %217 : vector<16x1xf32> to vector<16x256xf32>
    %219 = arith.addf %216, %218 : vector<16x256xf32>
    %cst_151 = arith.constant 0.000000e+00 : f32
    %220 = vector.broadcast %cst_151 : f32 to vector<16x256xf32>
    %221 = arith.maximumf %219, %220 : vector<16x256xf32>
    %222 = vector.extract_strided_slice %212 {offsets = [16, 0], sizes = [16, 256], strides = [1, 1]} : vector<32x256xf32> to vector<16x256xf32>
    %223 = vector.extract_strided_slice %174 {offsets = [16, 0], sizes = [16, 1], strides = [1, 1]} : vector<32x1xf32> to vector<16x1xf32>
    %224 = vector.broadcast %223 : vector<16x1xf32> to vector<16x256xf32>
    %225 = arith.mulf %222, %224 : vector<16x256xf32>
    %226 = vector.extract_strided_slice %177 {offsets = [16, 0], sizes = [16, 1], strides = [1, 1]} : vector<32x1xf32> to vector<16x1xf32>
    %227 = vector.broadcast %226 : vector<16x1xf32> to vector<16x256xf32>
    %228 = arith.addf %225, %227 : vector<16x256xf32>
    %cst_152 = arith.constant 0.000000e+00 : f32
    %229 = vector.broadcast %cst_152 : f32 to vector<16x256xf32>
    %230 = arith.maximumf %228, %229 : vector<16x256xf32>
    %231 = arith.addf %221, %230 : vector<16x256xf32>
    %c0_153 = arith.constant 0 : index
    %c0_154 = arith.constant 0 : index
    %c0_155 = arith.constant 0 : index
    %232 = vector.load %arg0[%c0_153, %c0_154, %c0_155] : memref<2x16x256xf32, #tpu.memory_space<vmem>>, vector<1x16x256xf32>
    %233 = vector.shape_cast %232 : vector<1x16x256xf32> to vector<16x256xf32>
    %234 = vector.extract_strided_slice %210 {offsets = [0, 0, 0], sizes = [1, 16, 1], strides = [1, 1, 1]} : vector<2x16x1xf32> to vector<1x16x1xf32>
    %235 = vector.shape_cast %234 : vector<1x16x1xf32> to vector<16x1xf32>
    %236 = vector.broadcast %235 : vector<16x1xf32> to vector<16x256xf32>
    %237 = arith.mulf %233, %236 : vector<16x256xf32>
    %238 = arith.addf %231, %237 : vector<16x256xf32>
    %cst_156 = arith.constant 0.000000e+00 : f32
    %239 = vector.broadcast %cst_156 : f32 to vector<16x256xf32>
    %240 = arith.maximumf %238, %239 : vector<16x256xf32>
    %c0_157 = arith.constant 0 : index
    %c0_158 = arith.constant 0 : index
    %c0_159 = arith.constant 0 : index
    %241 = vector.load %arg9[%c0_157, %c0_158, %c0_159] : memref<2x16x256xf32, #tpu.memory_space<vmem>>, vector<1x16x256xf32>
    %242 = vector.shape_cast %241 : vector<1x16x256xf32> to vector<16x256xf32>
    %243 = vector.shape_cast %240 : vector<16x256xf32> to vector<1x16x256xf32>
    tpu.vector_store %arg9[%c0_157, %c0_158, %c0_159], %243 {strides = array<i32>} : memref<2x16x256xf32, #tpu.memory_space<vmem>>, vector<1x16x256xf32>,
    %c1_160 = arith.constant 1 : index
    %c0_161 = arith.constant 0 : index
    %c0_162 = arith.constant 0 : index
    %244 = vector.load %arg12[%c1_160, %c0_161, %c0_162] : memref<2x32x256xf32, #tpu.memory_space<vmem>>, vector<1x32x256xf32>
    %245 = vector.shape_cast %244 : vector<1x32x256xf32> to vector<32x256xf32>
    %246 = vector.extract_strided_slice %245 {offsets = [0, 0], sizes = [16, 256], strides = [1, 1]} : vector<32x256xf32> to vector<16x256xf32>
    %247 = vector.extract_strided_slice %174 {offsets = [0, 0], sizes = [16, 1], strides = [1, 1]} : vector<32x1xf32> to vector<16x1xf32>
    %248 = vector.broadcast %247 : vector<16x1xf32> to vector<16x256xf32>
    %249 = arith.mulf %246, %248 : vector<16x256xf32>
    %250 = vector.extract_strided_slice %177 {offsets = [0, 0], sizes = [16, 1], strides = [1, 1]} : vector<32x1xf32> to vector<16x1xf32>
    %251 = vector.broadcast %250 : vector<16x1xf32> to vector<16x256xf32>
    %252 = arith.addf %249, %251 : vector<16x256xf32>
    %cst_163 = arith.constant 0.000000e+00 : f32
    %253 = vector.broadcast %cst_163 : f32 to vector<16x256xf32>
    %254 = arith.maximumf %252, %253 : vector<16x256xf32>
    %255 = vector.extract_strided_slice %245 {offsets = [16, 0], sizes = [16, 256], strides = [1, 1]} : vector<32x256xf32> to vector<16x256xf32>
    %256 = vector.extract_strided_slice %174 {offsets = [16, 0], sizes = [16, 1], strides = [1, 1]} : vector<32x1xf32> to vector<16x1xf32>
    %257 = vector.broadcast %256 : vector<16x1xf32> to vector<16x256xf32>
    %258 = arith.mulf %255, %257 : vector<16x256xf32>
    %259 = vector.extract_strided_slice %177 {offsets = [16, 0], sizes = [16, 1], strides = [1, 1]} : vector<32x1xf32> to vector<16x1xf32>
    %260 = vector.broadcast %259 : vector<16x1xf32> to vector<16x256xf32>
    %261 = arith.addf %258, %260 : vector<16x256xf32>
    %cst_164 = arith.constant 0.000000e+00 : f32
    %262 = vector.broadcast %cst_164 : f32 to vector<16x256xf32>
    %263 = arith.maximumf %261, %262 : vector<16x256xf32>
    %264 = arith.addf %254, %263 : vector<16x256xf32>
    %c1_165 = arith.constant 1 : index
    %c0_166 = arith.constant 0 : index
    %c0_167 = arith.constant 0 : index
    %265 = vector.load %arg0[%c1_165, %c0_166, %c0_167] : memref<2x16x256xf32, #tpu.memory_space<vmem>>, vector<1x16x256xf32>
    %266 = vector.shape_cast %265 : vector<1x16x256xf32> to vector<16x256xf32>
    %267 = vector.extract_strided_slice %210 {offsets = [1, 0, 0], sizes = [1, 16, 1], strides = [1, 1, 1]} : vector<2x16x1xf32> to vector<1x16x1xf32>
    %268 = vector.shape_cast %267 : vector<1x16x1xf32> to vector<16x1xf32>
    %269 = vector.broadcast %268 : vector<16x1xf32> to vector<16x256xf32>
    %270 = arith.mulf %266, %269 : vector<16x256xf32>
    %271 = arith.addf %264, %270 : vector<16x256xf32>
    %cst_168 = arith.constant 0.000000e+00 : f32
    %272 = vector.broadcast %cst_168 : f32 to vector<16x256xf32>
    %273 = arith.maximumf %271, %272 : vector<16x256xf32>
    %c1_169 = arith.constant 1 : index
    %c0_170 = arith.constant 0 : index
    %c0_171 = arith.constant 0 : index
    %274 = vector.load %arg9[%c1_169, %c0_170, %c0_171] : memref<2x16x256xf32, #tpu.memory_space<vmem>>, vector<1x16x256xf32>
    %275 = vector.shape_cast %274 : vector<1x16x256xf32> to vector<16x256xf32>
    %276 = vector.shape_cast %273 : vector<16x256xf32> to vector<1x16x256xf32>
    tpu.vector_store %arg9[%c1_169, %c0_170, %c0_171], %276 {strides = array<i32>} : memref<2x16x256xf32, #tpu.memory_space<vmem>>, vector<1x16x256xf32>,
    return
  }
}

</mosaic_0001>

<bundles_post_ra>
// kernel: tblock_forward.1
= control target key start
LH: loop header
LB: loop body
LE: loop exit
PB: predicated region body
PF: predicated region fallthrough
CT: control target
= control target key end

     0   :  { %v3230_v4 = vmov 0.0   ;;  %s3231_s19 = smov 34   ;;  %v3232_v16 = vmov 0.0|0.0   ;;  %s3233_s26 = smov 32   ;;  %v57_v26 = vlaneseq  ;;  %vm144_vm1 = vcmask 277504   ;;  %s4188_s0 = inlined_call_operand.vmem [shape: f32[2,16,256], index: 0, kind: input, shape index: {}]   ;;  %s4189_s5 = inlined_call_operand.vmem [shape: f32[2,16], index: 5, kind: input, shape index: {}]   ;;  %s4190_s1 = inlined_call_operand.vmem [shape: bf16[32,272], index: 1, kind: input, shape index: {}]   ;;  %s4191_s6 = inlined_call_operand.vmem [shape: f32[1,2], index: 6, kind: input, shape index: {}]   ;;  %s4192_s7 = inlined_call_operand.vmem [shape: f32[16,2], index: 7, kind: input, shape index: {}]   ;;  %s4193_s2 = inlined_call_operand.vmem [shape: f32[32,1], index: 2, kind: input, shape index: {}]   ;;  %s4194_s3 = inlined_call_operand.vmem [shape: f32[32,1], index: 3, kind: input, shape index: {}]   ;;  %s4195_s4 = inlined_call_operand.vmem [shape: f32[32,1], index: 4, kind: input, shape index: {}]   ;;  %s4196_s8 = inlined_call_operand.vmem [shape: f32[16,1], index: 8, kind: input, shape index: {}]   ;;  %s4197_s9 = inlined_call_operand.vmem [shape: f32[2,16,256], index: 9, kind: output, shape index: {}]  }
   0x1   :  { %v3302_v0 = vld [vmem:[%s4188_s0 + $0x10] sm:$0xff]  ;;  %v3307_v1 = vld [vmem:[%s4188_s0 + $0x18] sm:$0xff]  ;;  %v3312_v2 = vld [vmem:[%s4188_s0] sm:$0xff]  ;;  %s3234_s27 = smov 30   ;;  %s3235_s28 = smov 17   ;;  %vm213_vm5 = vcmask 261120  }
   0x2   :  { %v3316_v3 = vpack.i.bf16 %v3307_v1, %v3302_v0  ;;  %v3320_v5 = vpack.i.bf16 %v3312_v2, %v3230_v4  ;;  %v3325_v6 = vld [vmem:[%s4188_s0 + $0x20] sm:$0xff]  ;;  %v3330_v7 = vld [vmem:[%s4188_s0 + $0x8] sm:$0xff]  ;;  %v3343_v10 = vld [vmem:[%s4188_s0 + $0x30] sm:$0xff]  ;;  %v3365_v15 = vpack.c.bf16 %v3302_v0, %v3312_v2  ;;  %s3236_s29 = smov 16   ;;  %s3237_s30 = smov 15   ;;  %v3021_v21 = vpack.i.bf16 %v3302_v0, %v3230_v4 }
   0x3   :  { %v2851_v8 = vpack.i.bf16 %v3325_v6, %v3230_v4  ;;  %v3338_v9 = vpack.i.bf16 %v3230_v4, %v3330_v7  ;;  %v3348_v11 = vld [vmem:[%s4188_s0 + $0x38] sm:$0xff]  ;;  %v3353_v12 = vld [vmem:[%s4188_s0 + $0x28] sm:$0xff]  ;;  %v3371_v17 = vpack.c.bf16 %v3307_v1, %v3330_v7  ;;  %v3377_v18 = vpack.c.bf16 %v3343_v10, %v3325_v6  ;;  %s3238_s10 = smov 2   ;;  %s3239_s11 = smov 1  }
   0x4   :  { %2847 = vrot.lane.b32.xlu1 %v3316_v3, %s3231_s19  ;;  %2837 = vrot.lane.b32.xlu0 %v3320_v5, %s3231_s19  ;;  %v2861_v13 = vpack.i.bf16 %v3348_v11, %v3343_v10  ;;  %v3360_v14 = vpack.i.bf16 %v3230_v4, %v3353_v12  ;;  %v3381_v19 = vpack.c.bf16 %v3348_v11, %v3353_v12  ;;  %s3240_s12 = smov 127   ;;  %v3433_v27 = vand.u32 127, %v57_v26  ;;  %s3241_s13 = smov 126   ;;  %v3201_v51 = vld [vmem:[%s4190_s1 + $0x1c] ss:$12 sps:$4 sm:$0xff]  }
   0x5   :  { %v3016_v20 = vpack.i.bf16 %v3330_v7, %v3312_v2  ;;  %v3417_v22 = vpack.i.bf16 %v3230_v4, %v3307_v1  ;;  %v3031_v23 = vpack.i.bf16 %v3353_v12, %v3325_v6  ;;  %v3424_v24 = vpack.i.bf16 %v3343_v10, %v3230_v4  ;;  %s3242_s14 = smov 113   ;;  %s3243_s15 = smov 112  }
   0x6   :  { %v3428_v25 = vpack.i.bf16 %v3230_v4, %v3348_v11  ;;  %v59_v28 = vadd.s32 128, %v3433_v27  ;;  %v3440_v34 = vand.u32 15, %v3433_v27  ;;  %v3096_v57 = vpack.i.bf16 %v3348_v11, %v3230_v4  ;;  %s3244_s16 = smov 111   ;;  %s3245_s17 = smov 98  }
   0x7   :  { %vm278_vm6 = vcmask 244736   ;;  %vm363_vm11 = vcmask 138240   ;;  %s3246_s18 = smov 96  }
   0x8   :  { %2852 = vrot.lane.b32.xlu1 %v2851_v8, %s3231_s19  ;;  %2842 = vrot.lane.b32.xlu0 %v3338_v9, %s3231_s19  ;;  %v3437_v31 = vand.u32 15, %v59_v28  ;;  %vm84_vm2 = vcmp.ge.s32.totalorder %v3440_v34, 2  ;;  %vm90_vm8 = vcmp.lt.s32.totalorder %v3440_v34, 14  ;;  %vm86_vm13 = vcmp.ge.s32.totalorder %v3440_v34, 1 }
   0x9   :  { %vm3456_vm4 = vmpackc.low %vm84_vm2, %vm84_vm2 }
   0xa   :  { %vm85_vm0 = vcmp.ge.s32.totalorder %v3437_v31, 2  ;;  %vm91_vm7 = vcmp.lt.s32.totalorder %v3437_v31, 14  ;;  %vm3503_vm10 = vmpackc.low %vm90_vm8, %vm90_vm8  ;;  %vm87_vm12 = vcmp.ge.s32.totalorder %v3437_v31, 1  ;;  %vm89_vm2 = vcmp.lt.s32.totalorder %v3437_v31, 15 }
   0xb   :  { %vm3451_vm3 = vmpackc.low %vm85_vm0, %vm85_vm0  ;;  %vm432_vm0 = vcmask 130048   ;;  %vm578_vm8 = vcmask 15360  }
   0xc   :  { %2862 = vrot.lane.b32.xlu1 %v2861_v13, %s3231_s19  ;;  %2857 = vrot.lane.b32.xlu0 %v3360_v14, %s3231_s19  ;;  %vm3496_vm9 = vmpackc.low %vm91_vm7, %vm91_vm7  ;;  %s3247_s19 = smov 94  }
   0xd   :  { %vm3543_vm14 = vmpackc.low %vm87_vm12, %vm87_vm12  ;;  %vm756_vm12 = vcmask 1039360  }
   0xe   :  { %vm3550_vm15 = vmpackc.low %vm86_vm13, %vm86_vm13  ;;  %vm837_vm13 = vcmask 1031168  }
  0x10   :  { %201 = vrot.lane.b32.xlu0 %v3232_v16, %s3233_s26  ;;  %203 = vrot.lane.b32.xlu1 %v3365_v15, %s3233_s26 }
  0x14   :  { %205 = vrot.lane.b32.xlu0 %v3371_v17, %s3233_s26  ;;  %207 = vrot.lane.b32.xlu1 %v3232_v16, %s3233_s26 }
  0x18   :  { %209 = vrot.lane.b32.xlu0 %v3377_v18, %s3233_s26  ;;  %211 = vrot.lane.b32.xlu1 %v3381_v19, %s3233_s26 }
  0x1c   :  { %2867 = vrot.lane.b32.xlu0 %v3320_v5, %s3234_s27  ;;  %2872 = vrot.lane.b32.xlu1 %v3338_v9, %s3234_s27 }
  0x20   :  { %2877 = vrot.lane.b32.xlu0 %v3316_v3, %s3234_s27  ;;  %2882 = vrot.lane.b32.xlu1 %v2851_v8, %s3234_s27 }
  0x24   :  { %2887 = vrot.lane.b32.xlu0 %v3360_v14, %s3234_s27  ;;  %2892 = vrot.lane.b32.xlu1 %v2861_v13, %s3234_s27 }
  0x28   :  { %2897 = vrot.lane.b32.xlu0 %v3320_v5, %s3235_s28  ;;  %2902 = vrot.lane.b32.xlu1 %v3338_v9, %s3235_s28 }
  0x2c   :  { %2907 = vrot.lane.b32.xlu0 %v3316_v3, %s3235_s28  ;;  %2912 = vrot.lane.b32.xlu1 %v2851_v8, %s3235_s28 }
  0x30   :  { %2917 = vrot.lane.b32.xlu0 %v3360_v14, %s3235_s28  ;;  %2922 = vrot.lane.b32.xlu1 %v2861_v13, %s3235_s28 }
  0x34   :  { %420 = vrot.lane.b32.xlu0 %v3232_v16, %s3236_s29  ;;  %422 = vrot.lane.b32.xlu1 %v3365_v15, %s3236_s29 }
  0x38   :  { %424 = vrot.lane.b32.xlu0 %v3371_v17, %s3236_s29  ;;  %426 = vrot.lane.b32.xlu1 %v3232_v16, %s3236_s29 }
  0x3c   :  { %428 = vrot.lane.b32.xlu0 %v3377_v18, %s3236_s29  ;;  %430 = vrot.lane.b32.xlu1 %v3381_v19, %s3236_s29 }
  0x40   :  { %2927 = vrot.lane.b32.xlu0 %v3320_v5, %s3237_s30  ;;  %2932 = vrot.lane.b32.xlu1 %v3338_v9, %s3237_s30 }
  0x44   :  { %2937 = vrot.lane.b32.xlu0 %v3316_v3, %s3237_s30  ;;  %2942 = vrot.lane.b32.xlu1 %v2851_v8, %s3237_s30 }
  0x48   :  { %2947 = vrot.lane.b32.xlu0 %v3360_v14, %s3237_s30  ;;  %2952 = vrot.lane.b32.xlu1 %v2861_v13, %s3237_s30 }
  0x4c   :  { %2957 = vrot.lane.b32.xlu0 %v3320_v5, %s3238_s10  ;;  %2962 = vrot.lane.b32.xlu1 %v3338_v9, %s3238_s10 }
  0x50   :  { %2967 = vrot.lane.b32.xlu0 %v3316_v3, %s3238_s10  ;;  %2972 = vrot.lane.b32.xlu1 %v2851_v8, %s3238_s10 }
  0x54   :  { %2977 = vrot.lane.b32.xlu0 %v3360_v14, %s3238_s10  ;;  %2982 = vrot.lane.b32.xlu1 %v2861_v13, %s3238_s10 }
  0x58   :  { %2987 = vrot.lane.b32.xlu0 %v3320_v5, %s3239_s11  ;;  %2992 = vrot.lane.b32.xlu1 %v3338_v9, %s3239_s11 }
  0x5c   :  { %2997 = vrot.lane.b32.xlu0 %v3316_v3, %s3239_s11  ;;  %3002 = vrot.lane.b32.xlu1 %v2851_v8, %s3239_s11 }
  0x60   :  { %3007 = vrot.lane.b32.xlu0 %v3360_v14, %s3239_s11  ;;  %3012 = vrot.lane.b32.xlu1 %v2861_v13, %s3239_s11 }
  0x64   :  { %3017 = vrot.lane.b32.xlu0 %v3016_v20, %s3240_s12  ;;  %3022 = vrot.lane.b32.xlu1 %v3021_v21, %s3240_s12 }
  0x68   :  { %3027 = vrot.lane.b32.xlu0 %v3417_v22, %s3240_s12  ;;  %3032 = vrot.lane.b32.xlu1 %v3031_v23, %s3240_s12 }
  0x6c   :  { %3037 = vrot.lane.b32.xlu0 %v3424_v24, %s3240_s12  ;;  %3042 = vrot.lane.b32.xlu1 %v3428_v25, %s3240_s12 }
  0x70   :  { %3047 = vrot.lane.b32.xlu0 %v3016_v20, %s3241_s13  ;;  %3052 = vrot.lane.b32.xlu1 %v3021_v21, %s3241_s13 }
  0x74   :  { %3057 = vrot.lane.b32.xlu0 %v3417_v22, %s3241_s13  ;;  %3062 = vrot.lane.b32.xlu1 %v3031_v23, %s3241_s13 }
  0x76   :  { %v2848_v29 = vpop.permute.xlu1 %2847  ;;  %v2838_v30 = vpop.permute.xlu0 %2837 }
  0x77   :  { %v2840_v32 = vunpack.i.h.bf16 %v2838_v30  ;;  %v2839_v33 = vunpack.i.l.bf16 %v2838_v30  ;;  %v2850_v35 = vunpack.i.h.bf16 %v2848_v29  ;;  %v2849_v36 = vunpack.i.l.bf16 %v2848_v29 }
  0x78   :  { %3067 = vrot.lane.b32.xlu0 %v3424_v24, %s3241_s13  ;;  %3072 = vrot.lane.b32.xlu1 %v3428_v25, %s3241_s13 }
  0x79   :  { %v145_v41 = vsel %vm144_vm1, %v2839_v33, %v2840_v32  ;;  %v148_v45 = vsel %vm144_vm1, %v2849_v36, %v2850_v35 }
  0x7a   :  { %v2853_v37 = vpop.permute.xlu1 %2852  ;;  %v2843_v38 = vpop.permute.xlu0 %2842 }
  0x7b   :  { %v2845_v39 = vunpack.i.h.bf16 %v2843_v38  ;;  %v2844_v40 = vunpack.i.l.bf16 %v2843_v38  ;;  %v2855_v42 = vunpack.i.h.bf16 %v2853_v37  ;;  %v2854_v43 = vunpack.i.l.bf16 %v2853_v37 }
  0x7c   :  { %3077 = vrot.lane.b32.xlu0 %v3016_v20, %s3242_s14  ;;  %3082 = vrot.lane.b32.xlu1 %v3021_v21, %s3242_s14 }
  0x7d   :  { %v146_v44 = vsel %vm144_vm1, %v2840_v32, %v2844_v40  ;;  %v147_v47 = vsel %vm144_vm1, %v2845_v39, %v2849_v36  ;;  %v149_v58 = vsel %vm144_vm1, %v2854_v43, %v2855_v42 }
  0x7e   :  { %v2863_v48 = vpop.permute.xlu1 %2862  ;;  %v2858_v49 = vpop.permute.xlu0 %2857  ;;  %v2642_v50 = vpack.c.bf16 %v148_v45, %v146_v44  ;;  %v2645_v52 = vpack.c.bf16 %v147_v47, %v145_v41 }
  0x7f   :  { %v2865_v53 = vunpack.i.h.bf16 %v2863_v48  ;;  %v2864_v54 = vunpack.i.l.bf16 %v2863_v48  ;;  %v2860_v55 = vunpack.i.h.bf16 %v2858_v49  ;;  %v2859_v56 = vunpack.i.l.bf16 %v2858_v49  ;;  %v3205_v48 = vld [vmem:[%s4190_s1 + $0x20] ss:$12 sps:$4 sm:$0xff]  }
  0x80   :  { %3087 = vrot.lane.b32.xlu0 %v3417_v22, %s3242_s14  ;;  %2643 = vmatprep.subr.msk.bf16.mxu0 %vm3451_vm3, %v2642_v50 }
  0x81   :  { %3092 = vrot.lane.b32.xlu1 %v3031_v23, %s3242_s14  ;;  %2646 = vmatpush1.bf16.msk.msra.mxu0 %vm3456_vm4, %v2645_v52  ;;  %v150_v59 = vsel %vm144_vm1, %v2855_v42, %v2859_v56  ;;  %v152_v60 = vsel %vm144_vm1, %v2864_v54, %v2865_v53  ;;  %v151_v61 = vsel %vm144_vm1, %v2860_v55, %v2864_v54  ;;  %vm497_vm1 = vcmask 121856  }
  0x82   :  { %v202_v62 = vpop.permute.xlu0 %201  ;;  %v204_v63 = vpop.permute.xlu1 %203  ;;  %v2714_v3 = vpack.c.bf16 %v152_v60, %v150_v59  ;;  %v2717_v5 = vpack.c.bf16 %v151_v61, %v149_v58  ;;  %v3514_v60 = vpack.i.bf16 %v3302_v0, %v3312_v2  ;;  %v3518_v61 = vpack.i.bf16 %v3343_v10, %v3325_v6 }
  0x83   :  { %v214_v20 = vsel %vm213_vm5, %v202_v62, %v204_v63 }
  0x84   :  { %3097 = vrot.lane.b32.xlu0 %v3096_v57, %s3242_s14  ;;  %2715 = vmatprep.subr.msk.bf16.mxu1 %vm3451_vm3, %v2714_v3 }
  0x85   :  { %3102 = vrot.lane.b32.xlu1 %v3424_v24, %s3242_s14  ;;  %2718 = vmatpush1.bf16.msk.msra.mxu1 %vm3456_vm4, %v2717_v5 }
  0x86   :  { %v206_v4 = vpop.permute.xlu0 %205  ;;  %v208_v8 = vpop.permute.xlu1 %207 }
  0x87   :  { %v215_v13 = vsel %vm213_vm5, %v204_v63, %v206_v4 }
  0x88   :  { %977 = vrot.lane.b32.xlu0 %v3371_v17, %s3243_s15  ;;  %1397 = vmatprep.subr.bf16.mxu0 %v215_v13 }
  0x89   :  { %979 = vrot.lane.b32.xlu1 %v3232_v16, %s3243_s15  ;;  %1398 = vmatpush1.bf16.msra.mxu0 %v214_v20 }
  0x8a   :  { %v210_v21 = vpop.permute.xlu0 %209  ;;  %v212_v23 = vpop.permute.xlu1 %211 }
  0x8b   :  { %v217_v28 = vsel %vm213_vm5, %v210_v21, %v212_v23  ;;  %v216_v29 = vsel %vm213_vm5, %v208_v8, %v210_v21  ;;  %vm88_vm5 = vcmp.lt.s32.totalorder %v3440_v34, 15 }
  0x8c   :  { %983 = vrot.lane.b32.xlu0 %v3381_v19, %s3243_s15  ;;  %1586 = vmatprep.subr.bf16.mxu1 %v217_v28  ;;  %vm3590_vm7 = vmpackc.low %vm88_vm5, %vm88_vm5  ;;  %vm1048_vm5 = vcmask 908288  }
  0x8d   :  { %985 = vrot.lane.b32.xlu1 %v3232_v16, %s3243_s15  ;;  %1587 = vmatpush1.bf16.msra.mxu1 %v216_v29 }
  0x8e   :  { %v2868_v24 = vpop.permute.xlu0 %2867  ;;  %v2873_v30 = vpop.permute.xlu1 %2872 }
  0x8f   :  { %v2869_v32 = vunpack.i.l.bf16 %v2868_v24  ;;  %v2870_v33 = vunpack.i.h.bf16 %v2868_v24  ;;  %v2874_v35 = vunpack.i.l.bf16 %v2873_v30  ;;  %v2875_v39 = vunpack.i.h.bf16 %v2873_v30 }
  0x90   :  { %975 = vrot.lane.b32.xlu0 %v3365_v15, %s3243_s15 }
  0x91   :  { %981 = vrot.lane.b32.xlu1 %v3377_v18, %s3243_s15  ;;  %v279_v38 = vsel %vm278_vm6, %v2869_v32, %v2870_v33  ;;  %v280_v44 = vsel %vm278_vm6, %v2870_v33, %v2874_v35 }
  0x92   :  { %v2878_v36 = vpop.permute.xlu0 %2877  ;;  %v2883_v37 = vpop.permute.xlu1 %2882 }
  0x93   :  { %v2880_v40 = vunpack.i.h.bf16 %v2878_v36  ;;  %v2879_v41 = vunpack.i.l.bf16 %v2878_v36  ;;  %v2885_v42 = vunpack.i.h.bf16 %v2883_v37  ;;  %v2884_v43 = vunpack.i.l.bf16 %v2883_v37 }
  0x94   :  { %3107 = vrot.lane.b32.xlu0 %v3338_v9, %s3244_s16 }
  0x95   :  { %v281_v45 = vsel %vm278_vm6, %v2875_v39, %v2879_v41  ;;  %v282_v47 = vsel %vm278_vm6, %v2879_v41, %v2880_v40  ;;  %3112 = vrot.lane.b32.xlu1 %v3417_v22, %s3244_s16  ;;  %v283_v59 = vsel %vm278_vm6, %v2884_v43, %v2885_v42 }
  0x96   :  { %v2888_v49 = vpop.permute.xlu0 %2887  ;;  %v2893_v50 = vpop.permute.xlu1 %2892  ;;  %v2648_v52 = vpack.c.bf16 %v282_v47, %v280_v44  ;;  %v2651_v54 = vpack.c.bf16 %v281_v45, %v279_v38 }
  0x97   :  { %v2890_v55 = vunpack.i.h.bf16 %v2888_v49  ;;  %v2889_v56 = vunpack.i.l.bf16 %v2888_v49  ;;  %v2895_v57 = vunpack.i.h.bf16 %v2893_v50  ;;  %v2894_v58 = vunpack.i.l.bf16 %v2893_v50 }
  0x98   :  { %3117 = vrot.lane.b32.xlu0 %v3360_v14, %s3244_s16  ;;  %2649 = vmatprep.subr.msk.bf16.mxu0 %vm3496_vm9, %v2648_v52 }
  0x99   :  { %v284_v62 = vsel %vm278_vm6, %v2885_v42, %v2889_v56  ;;  %v285_v63 = vsel %vm278_vm6, %v2890_v55, %v2894_v58  ;;  %v286_v3 = vsel %vm278_vm6, %v2894_v58, %v2895_v57  ;;  %3122 = vrot.lane.b32.xlu1 %v3428_v25, %s3244_s16  ;;  %2652 = vmatpush1.bf16.msk.msra.mxu0 %vm3503_vm10, %v2651_v54  ;;  %vm3586_vm6 = vmpackc.low %vm89_vm2, %vm89_vm2  ;;  %vm987_vm2 = vcmask 916480  }
  0x9a   :  { %v2898_v5 = vpop.permute.xlu0 %2897  ;;  %v2903_v4 = vpop.permute.xlu1 %2902  ;;  %v2720_v8 = vpack.c.bf16 %v286_v3, %v284_v62  ;;  %v2723_v13 = vpack.c.bf16 %v285_v63, %v283_v59 }
  0x9b   :  { %v2899_v20 = vunpack.i.l.bf16 %v2898_v5  ;;  %v2900_v21 = vunpack.i.h.bf16 %v2898_v5  ;;  %v2904_v23 = vunpack.i.l.bf16 %v2903_v4  ;;  %v2905_v30 = vunpack.i.h.bf16 %v2903_v4 }
  0x9c   :  { %3127 = vrot.lane.b32.xlu0 %v3514_v60, %s3244_s16  ;;  %2721 = vmatprep.subr.msk.bf16.mxu1 %vm3496_vm9, %v2720_v8 }
  0x9d   :  { %3132 = vrot.lane.b32.xlu1 %v3518_v61, %s3244_s16  ;;  %2724 = vmatpush1.bf16.msk.msra.mxu1 %vm3503_vm10, %v2723_v13  ;;  %v364_v24 = vsel %vm363_vm11, %v2899_v20, %v2900_v21  ;;  %v365_v37 = vsel %vm363_vm11, %v2900_v21, %v2904_v23 }
  0x9e   :  { %v2908_v28 = vpop.permute.xlu0 %2907  ;;  %v2913_v29 = vpop.permute.xlu1 %2912 }
  0x9f   :  { %v2910_v32 = vunpack.i.h.bf16 %v2908_v28  ;;  %v2909_v33 = vunpack.i.l.bf16 %v2908_v28  ;;  %v2915_v35 = vunpack.i.h.bf16 %v2913_v29  ;;  %v2914_v36 = vunpack.i.l.bf16 %v2913_v29 }
  0xa0   :  { %3137 = vrot.lane.b32.xlu0 %v3338_v9, %s3245_s17 }
  0xa1   :  { %v366_v38 = vsel %vm363_vm11, %v2905_v30, %v2909_v33  ;;  %v367_v39 = vsel %vm363_vm11, %v2909_v33, %v2910_v32  ;;  %3142 = vrot.lane.b32.xlu1 %v3417_v22, %s3245_s17  ;;  %v368_v54 = vsel %vm363_vm11, %v2914_v36, %v2915_v35 }
  0xa2   :  { %v2918_v41 = vpop.permute.xlu0 %2917  ;;  %v2923_v42 = vpop.permute.xlu1 %2922  ;;  %v2654_v43 = vpack.c.bf16 %v367_v39, %v365_v37  ;;  %v2657_v45 = vpack.c.bf16 %v366_v38, %v364_v24 }
  0xa3   :  { %v2920_v47 = vunpack.i.h.bf16 %v2918_v41  ;;  %v2919_v49 = vunpack.i.l.bf16 %v2918_v41  ;;  %v2925_v50 = vunpack.i.h.bf16 %v2923_v42  ;;  %v2924_v52 = vunpack.i.l.bf16 %v2923_v42 }
  0xa4   :  { %3147 = vrot.lane.b32.xlu0 %v3360_v14, %s3245_s17  ;;  %2655 = vmatprep.subr.msk.bf16.mxu0 %vm3543_vm14, %v2654_v43 }
  0xa5   :  { %v369_v55 = vsel %vm363_vm11, %v2915_v35, %v2919_v49  ;;  %v370_v56 = vsel %vm363_vm11, %v2920_v47, %v2924_v52  ;;  %v371_v57 = vsel %vm363_vm11, %v2924_v52, %v2925_v50  ;;  %3152 = vrot.lane.b32.xlu1 %v3428_v25, %s3245_s17  ;;  %2658 = vmatpush1.bf16.msk.msra.mxu0 %vm3550_vm15, %v2657_v45  ;;  %vm659_vm11 = vcmask 7168  }
  0xa6   :  { %v421_v58 = vpop.permute.xlu0 %420  ;;  %v423_v59 = vpop.permute.xlu1 %422  ;;  %v2726_v62 = vpack.c.bf16 %v371_v57, %v369_v55  ;;  %v2729_v63 = vpack.c.bf16 %v370_v56, %v368_v54 }
  0xa7   :  { %v433_v8 = vsel %vm432_vm0, %v421_v58, %v423_v59 }
  0xa8   :  { %3157 = vrot.lane.b32.xlu0 %v3514_v60, %s3245_s17  ;;  %2727 = vmatprep.subr.msk.bf16.mxu1 %vm3543_vm14, %v2726_v62 }
  0xa9   :  { %3162 = vrot.lane.b32.xlu1 %v3518_v61, %s3245_s17  ;;  %2730 = vmatpush1.bf16.msk.msra.mxu1 %vm3550_vm15, %v2729_v63 }
  0xaa   :  { %v425_v3 = vpop.permute.xlu0 %424  ;;  %v427_v5 = vpop.permute.xlu1 %426 }
  0xab   :  { %v434_v4 = vsel %vm432_vm0, %v423_v59, %v425_v3 }
  0xac   :  { %1188 = vrot.lane.b32.xlu0 %v3371_v17, %s3246_s18  ;;  %1403 = vmatprep.subr.bf16.mxu0 %v434_v4 }
  0xad   :  { %1190 = vrot.lane.b32.xlu1 %v3232_v16, %s3246_s18  ;;  %1404 = vmatpush1.bf16.msra.mxu0 %v433_v8 }
  0xae   :  { %v429_v13 = vpop.permute.xlu0 %428  ;;  %v431_v20 = vpop.permute.xlu1 %430 }
  0xaf   :  { %v436_v21 = vsel %vm432_vm0, %v429_v13, %v431_v20  ;;  %v435_v23 = vsel %vm432_vm0, %v427_v5, %v429_v13 }
  0xb0   :  { %1194 = vrot.lane.b32.xlu0 %v3381_v19, %s3246_s18  ;;  %1592 = vmatprep.subr.bf16.mxu1 %v436_v21 }
  0xb1   :  { %1196 = vrot.lane.b32.xlu1 %v3232_v16, %s3246_s18  ;;  %1593 = vmatpush1.bf16.msra.mxu1 %v435_v23 }
  0xb2   :  { %v2928_v28 = vpop.permute.xlu0 %2927  ;;  %v2933_v29 = vpop.permute.xlu1 %2932 }
  0xb3   :  { %v2929_v24 = vunpack.i.l.bf16 %v2928_v28  ;;  %v2930_v30 = vunpack.i.h.bf16 %v2928_v28  ;;  %v2934_v32 = vunpack.i.l.bf16 %v2933_v29  ;;  %v2935_v16 = vunpack.i.h.bf16 %v2933_v29 }
  0xb4   :  { %1186 = vrot.lane.b32.xlu0 %v3365_v15, %s3246_s18 }
  0xb5   :  { %1192 = vrot.lane.b32.xlu1 %v3377_v18, %s3246_s18  ;;  %v498_v36 = vsel %vm497_vm1, %v2929_v24, %v2930_v30  ;;  %v499_v39 = vsel %vm497_vm1, %v2930_v30, %v2934_v32 }
  0xb6   :  { %v2938_v33 = vpop.permute.xlu0 %2937  ;;  %v2943_v35 = vpop.permute.xlu1 %2942 }
  0xb7   :  { %v2940_v37 = vunpack.i.h.bf16 %v2938_v33  ;;  %v2939_v38 = vunpack.i.l.bf16 %v2938_v33  ;;  %v2945_v43 = vunpack.i.h.bf16 %v2943_v35  ;;  %v2944_v45 = vunpack.i.l.bf16 %v2943_v35 }
  0xb9   :  { %v500_v41 = vsel %vm497_vm1, %v2935_v16, %v2939_v38  ;;  %v501_v42 = vsel %vm497_vm1, %v2939_v38, %v2940_v37  ;;  %v502_v58 = vsel %vm497_vm1, %v2944_v45, %v2945_v43 }
  0xba   :  { %v2948_v31 = vpop.permute.xlu0 %2947  ;;  %v2953_v49 = vpop.permute.xlu1 %2952  ;;  %v2660_v34 = vpack.c.bf16 %v501_v42, %v499_v39  ;;  %v2663_v52 = vpack.c.bf16 %v500_v41, %v498_v36 }
  0xbb   :  { %v2950_v54 = vunpack.i.h.bf16 %v2948_v31  ;;  %v2949_v55 = vunpack.i.l.bf16 %v2948_v31  ;;  %v2955_v56 = vunpack.i.h.bf16 %v2953_v49  ;;  %v2954_v57 = vunpack.i.l.bf16 %v2953_v49 }
  0xbc   :  { %2661 = vmatprep.subr.msk.bf16.mxu0 %vm3586_vm6, %v2660_v34 }
  0xbd   :  { %v503_v59 = vsel %vm497_vm1, %v2945_v43, %v2949_v55  ;;  %v504_v62 = vsel %vm497_vm1, %v2950_v54, %v2954_v57  ;;  %v505_v63 = vsel %vm497_vm1, %v2954_v57, %v2955_v56  ;;  %2664 = vmatpush1.bf16.msk.msra.mxu0 %vm3590_vm7, %v2663_v52  ;;  %vm918_vm1 = vcmask 924672  }
  0xbe   :  { %v2958_v3 = vpop.permute.xlu0 %2957  ;;  %v2963_v5 = vpop.permute.xlu1 %2962  ;;  %v2732_v4 = vpack.c.bf16 %v505_v63, %v503_v59  ;;  %v2735_v8 = vpack.c.bf16 %v504_v62, %v502_v58 }
  0xbf   :  { %v2959_v13 = vunpack.i.l.bf16 %v2958_v3  ;;  %v2960_v20 = vunpack.i.h.bf16 %v2958_v3  ;;  %v2964_v21 = vunpack.i.l.bf16 %v2963_v5  ;;  %v2965_v24 = vunpack.i.h.bf16 %v2963_v5 }
  0xc0   :  { %2733 = vmatprep.subr.msk.bf16.mxu1 %vm3586_vm6, %v2732_v4 }
  0xc1   :  { %2736 = vmatpush1.bf16.msk.msra.mxu1 %vm3590_vm7, %v2735_v8  ;;  %v579_v29 = vsel %vm578_vm8, %v2959_v13, %v2960_v20  ;;  %v580_v33 = vsel %vm578_vm8, %v2960_v20, %v2964_v21  ;;  %v1791_v8 = vadd.f32 %v3330_v7, %v3312_v2  ;;  %v1797_v2 = vadd.f32 %v3353_v12, %v3325_v6 }
  0xc2   :  { %v2968_v23 = vpop.permute.xlu0 %2967  ;;  %v2973_v28 = vpop.permute.xlu1 %2972 }
  0xc3   :  { %v2970_v30 = vunpack.i.h.bf16 %v2968_v23  ;;  %v2969_v32 = vunpack.i.l.bf16 %v2968_v23  ;;  %v2975_v16 = vunpack.i.h.bf16 %v2973_v28  ;;  %v2974_v37 = vunpack.i.l.bf16 %v2973_v28 }
  0xc5   :  { %v581_v35 = vsel %vm578_vm8, %v2965_v24, %v2969_v32  ;;  %v582_v36 = vsel %vm578_vm8, %v2969_v32, %v2970_v30  ;;  %v583_v34 = vsel %vm578_vm8, %v2974_v37, %v2975_v16 }
  0xc6   :  { %v2978_v38 = vpop.permute.xlu0 %2977  ;;  %v2983_v39 = vpop.permute.xlu1 %2982  ;;  %v2666_v41 = vpack.c.bf16 %v582_v36, %v580_v33  ;;  %v2669_v42 = vpack.c.bf16 %v581_v35, %v579_v29 }
  0xc7   :  { %v2980_v43 = vunpack.i.h.bf16 %v2978_v38  ;;  %v2979_v45 = vunpack.i.l.bf16 %v2978_v38  ;;  %v2985_v31 = vunpack.i.h.bf16 %v2983_v39  ;;  %v2984_v49 = vunpack.i.l.bf16 %v2983_v39 }
  0xc8   :  { %2667 = vmatprep.subr.msk.bf16.mxu0 %vm3451_vm3, %v2666_v41  ;;  %v1794_v41 = vadd.f32 %v3307_v1, %v3302_v0  ;;  %v1800_v0 = vadd.f32 %v3348_v11, %v3343_v10 }
  0xc9   :  { %v584_v52 = vsel %vm578_vm8, %v2975_v16, %v2979_v45  ;;  %v585_v54 = vsel %vm578_vm8, %v2980_v43, %v2984_v49  ;;  %v586_v55 = vsel %vm578_vm8, %v2984_v49, %v2985_v31  ;;  %2670 = vmatpush1.bf16.msk.msra.mxu0 %vm3456_vm4, %v2669_v42 }
  0xca   :  { %v2988_v56 = vpop.permute.xlu0 %2987  ;;  %v2993_v57 = vpop.permute.xlu1 %2992  ;;  %v2738_v58 = vpack.c.bf16 %v586_v55, %v584_v52  ;;  %v2741_v59 = vpack.c.bf16 %v585_v54, %v583_v34 }
  0xcb   :  { %v2989_v62 = vunpack.i.l.bf16 %v2988_v56  ;;  %v2990_v63 = vunpack.i.h.bf16 %v2988_v56  ;;  %v2994_v3 = vunpack.i.l.bf16 %v2993_v57  ;;  %v2995_v20 = vunpack.i.h.bf16 %v2993_v57 }
  0xcc   :  { %2739 = vmatprep.subr.msk.bf16.mxu1 %vm3451_vm3, %v2738_v58 }
  0xcd   :  { %2742 = vmatpush1.bf16.msk.msra.mxu1 %vm3456_vm4, %v2741_v59  ;;  %v660_v13 = vsel %vm659_vm11, %v2989_v62, %v2990_v63  ;;  %v661_v28 = vsel %vm659_vm11, %v2990_v63, %v2994_v3 }
  0xce   :  { %v2998_v5 = vpop.permute.xlu0 %2997  ;;  %v3003_v4 = vpop.permute.xlu1 %3002 }
  0xcf   :  { %v3000_v21 = vunpack.i.h.bf16 %v2998_v5  ;;  %v2999_v23 = vunpack.i.l.bf16 %v2998_v5  ;;  %v3005_v30 = vunpack.i.h.bf16 %v3003_v4  ;;  %v3004_v32 = vunpack.i.l.bf16 %v3003_v4 }
  0xd1   :  { %v662_v29 = vsel %vm659_vm11, %v2995_v20, %v2999_v23  ;;  %v663_v24 = vsel %vm659_vm11, %v2999_v23, %v3000_v21  ;;  %v664_v42 = vsel %vm659_vm11, %v3004_v32, %v3005_v30 }
  0xd2   :  { %v3008_v33 = vpop.permute.xlu0 %3007  ;;  %v3013_v35 = vpop.permute.xlu1 %3012  ;;  %v2672_v36 = vpack.c.bf16 %v663_v24, %v661_v28  ;;  %v2675_v16 = vpack.c.bf16 %v662_v29, %v660_v13 }
  0xd3   :  { %v3010_v7 = vunpack.i.h.bf16 %v3008_v33  ;;  %v3009_v37 = vunpack.i.l.bf16 %v3008_v33  ;;  %v3015_v38 = vunpack.i.h.bf16 %v3013_v35  ;;  %v3014_v39 = vunpack.i.l.bf16 %v3013_v35  ;;  %1792 = vadd.xlane.f32.xlu0 %v1791_v8 }
  0xd4   :  { %2673 = vmatprep.subr.msk.bf16.mxu0 %vm3543_vm14, %v2672_v36 }
  0xd5   :  { %v665_v43 = vsel %vm659_vm11, %v3005_v30, %v3009_v37  ;;  %v666_v45 = vsel %vm659_vm11, %v3010_v7, %v3014_v39  ;;  %v667_v31 = vsel %vm659_vm11, %v3014_v39, %v3015_v38  ;;  %2676 = vmatpush1.bf16.msk.msra.mxu0 %vm3550_vm15, %v2675_v16  ;;  %vm2367_vm11 = vcmask 1045509  }
  0xd6   :  { %v3018_v6 = vpop.permute.xlu0 %3017  ;;  %v3023_v12 = vpop.permute.xlu1 %3022  ;;  %v2744_v49 = vpack.c.bf16 %v667_v31, %v665_v43  ;;  %v2747_v34 = vpack.c.bf16 %v666_v45, %v664_v42  ;;  %1411 = vmatprep.subr.bf16.mxu0 %v3371_v17 }
  0xd7   :  { %v3019_v52 = vunpack.i.l.bf16 %v3018_v6  ;;  %1798 = vadd.xlane.f32.xlu0 %v1797_v2  ;;  %v3020_v1 = vunpack.i.h.bf16 %v3018_v6  ;;  %v3024_v54 = vunpack.i.l.bf16 %v3023_v12  ;;  %v3025_v57 = vunpack.i.h.bf16 %v3023_v12 }
  0xd8   :  { %2745 = vmatprep.subr.msk.bf16.mxu1 %vm3543_vm14, %v2744_v49 }
  0xd9   :  { %1795 = vadd.xlane.f32.xlu1 %v1794_v41  ;;  %2748 = vmatpush1.bf16.msk.msra.mxu1 %vm3550_vm15, %v2747_v34  ;;  %v757_v17 = vsel %vm756_vm12, %v3019_v52, %v3020_v1  ;;  %v758_v58 = vsel %vm756_vm12, %v3020_v1, %v3024_v54 }
  0xda   :  { %v3028_v55 = vpop.permute.xlu0 %3027  ;;  %v3033_v56 = vpop.permute.xlu1 %3032  ;;  %1412 = vmatpush1.bf16.msra.mxu0 %v3365_v15  ;;  %1600 = vmatprep.subr.bf16.mxu1 %v3381_v19 }
  0xdb   :  { %v3030_v10 = vunpack.i.h.bf16 %v3028_v55  ;;  %v3029_v11 = vunpack.i.l.bf16 %v3028_v55  ;;  %1801 = vadd.xlane.f32.xlu0 %v1800_v0  ;;  %v3035_v63 = vunpack.i.h.bf16 %v3033_v56  ;;  %v3034_v3 = vunpack.i.l.bf16 %v3033_v56 }
  0xdc   :  { %v3673_v56 = vshrl.u32 %v57_v26, 7 }
  0xdd   :  { %v759_v59 = vsel %vm756_vm12, %v3025_v57, %v3029_v11  ;;  %v760_v62 = vsel %vm756_vm12, %v3029_v11, %v3030_v10  ;;  %1601 = vmatpush1.bf16.msra.mxu1 %v3377_v18  ;;  %v761_v23 = vsel %vm756_vm12, %v3034_v3, %v3035_v63 }
  0xde   :  { %v3038_v5 = vpop.permute.xlu0 %3037  ;;  %v3043_v15 = vpop.permute.xlu1 %3042  ;;  %v2678_v4 = vpack.c.bf16 %v760_v62, %v758_v58  ;;  %v2681_v19 = vpack.c.bf16 %v759_v59, %v757_v17 }
  0xdf   :  { %v3040_v8 = vunpack.i.h.bf16 %v3038_v5  ;;  %v3039_v13 = vunpack.i.l.bf16 %v3038_v5  ;;  %v3045_v20 = vunpack.i.h.bf16 %v3043_v15  ;;  %v3044_v21 = vunpack.i.l.bf16 %v3043_v15  ;;  %v1808_v15 = vld [vmem:[%s4189_s5] sm:$0x3] }
  0xe0   :  { %2679 = vmatprep.subr.msk.bf16.mxu0 %vm3586_vm6, %v2678_v4 }
  0xe1   :  { %v762_v28 = vsel %vm756_vm12, %v3035_v63, %v3039_v13  ;;  %v763_v29 = vsel %vm756_vm12, %v3040_v8, %v3044_v21  ;;  %v764_v24 = vsel %vm756_vm12, %v3044_v21, %v3045_v20  ;;  %2682 = vmatpush1.bf16.msk.msra.mxu0 %vm3590_vm7, %v2681_v19  ;;  %v3688_v63 = vsub.s32 0, %v3673_v56 }
  0xe2   :  { %v3048_v18 = vpop.permute.xlu0 %3047  ;;  %v3053_v30 = vpop.permute.xlu1 %3052  ;;  %v2750_v32 = vpack.c.bf16 %v764_v24, %v762_v28  ;;  %v2753_v33 = vpack.c.bf16 %v763_v29, %v761_v23  ;;  %v3702_v23 = vsub.s32 1, %v3673_v56  ;;  %vm2369_vm12 = vcmask 1046534  }
  0xe3   :  { %v3049_v35 = vunpack.i.l.bf16 %v3048_v18  ;;  %v3050_v36 = vunpack.i.h.bf16 %v3048_v18  ;;  %v3054_v16 = vunpack.i.l.bf16 %v3053_v30  ;;  %v3055_v38 = vunpack.i.h.bf16 %v3053_v30 }
  0xe4   :  { %2751 = vmatprep.subr.msk.bf16.mxu1 %vm3586_vm6, %v2750_v32  ;;  %v1813_v21 = vrot.slane %v1808_v15, %v3688_v63 }
  0xe5   :  { %2754 = vmatpush1.bf16.msk.msra.mxu1 %vm3590_vm7, %v2753_v33  ;;  %v838_v37 = vsel %vm837_vm13, %v3049_v35, %v3050_v36  ;;  %v839_v42 = vsel %vm837_vm13, %v3050_v36, %v3054_v16 }
  0xe6   :  { %v3058_v2 = vpop.permute.xlu0 %3057  ;;  %v3063_v7 = vpop.permute.xlu1 %3062 }
  0xe7   :  { %v3060_v39 = vunpack.i.h.bf16 %v3058_v2  ;;  %v3059_v41 = vunpack.i.l.bf16 %v3058_v2  ;;  %v3065_v31 = vunpack.i.h.bf16 %v3063_v7  ;;  %v3064_v6 = vunpack.i.l.bf16 %v3063_v7 }
  0xe8   :  { %v3248_v2 = vmov 0  }
  0xe9   :  { %v840_v43 = vsel %vm837_vm13, %v3055_v38, %v3059_v41  ;;  %v841_v45 = vsel %vm837_vm13, %v3059_v41, %v3060_v39  ;;  %v842_v17 = vsel %vm837_vm13, %v3064_v6, %v3065_v31  ;;  %3196 = vset.pattern.permute.xlu0 %v3248_v2  ;;  %3197 = vset.pattern.permute.xlu1 %v3248_v2 }
  0xea   :  { %v3068_v12 = vpop.permute.xlu0 %3067  ;;  %v3073_v49 = vpop.permute.xlu1 %3072  ;;  %v2684_v34 = vpack.c.bf16 %v841_v45, %v839_v42  ;;  %v2687_v52 = vpack.c.bf16 %v840_v43, %v838_v37  ;;  %3167 = vrot.lane.b32.xlu1 %v3338_v9, %s3247_s19  ;;  %v1824_v42 = vrot.slane %v1808_v15, %v3702_v23 }
  0xeb   :  { %v3070_v0 = vunpack.i.h.bf16 %v3068_v12  ;;  %v3069_v1 = vunpack.i.l.bf16 %v3068_v12  ;;  %v3075_v54 = vunpack.i.h.bf16 %v3073_v49  ;;  %v3074_v55 = vunpack.i.l.bf16 %v3073_v49 }
  0xec   :  { %2685 = vmatprep.subr.msk.bf16.mxu0 %vm3496_vm9, %v2684_v34 }
  0xed   :  { %v843_v57 = vsel %vm837_vm13, %v3065_v31, %v3069_v1  ;;  %v844_v10 = vsel %vm837_vm13, %v3070_v0, %v3074_v55  ;;  %v845_v11 = vsel %vm837_vm13, %v3074_v55, %v3075_v54  ;;  %2688 = vmatpush1.bf16.msk.msra.mxu0 %vm3503_vm10, %v2687_v52  ;;  %vm2371_vm13 = vcmask 1047559  }
  0xee   :  { %v3078_v9 = vpop.permute.xlu0 %3077  ;;  %v3083_v58 = vpop.permute.xlu1 %3082  ;;  %v2756_v59 = vpack.c.bf16 %v845_v11, %v843_v57  ;;  %v2759_v62 = vpack.c.bf16 %v844_v10, %v842_v17  ;;  %3177 = vrot.lane.b32.xlu1 %v3360_v14, %s3247_s19 }
  0xef   :  { %v3079_v26 = vunpack.i.l.bf16 %v3078_v9  ;;  %v3080_v3 = vunpack.i.h.bf16 %v3078_v9  ;;  %v3084_v5 = vunpack.i.l.bf16 %v3083_v58  ;;  %v3085_v19 = vunpack.i.h.bf16 %v3083_v58 }
  0xf0   :  { %2757 = vmatprep.subr.msk.bf16.mxu1 %vm3496_vm9, %v2756_v59 }
  0xf1   :  { %2760 = vmatpush1.bf16.msk.msra.mxu1 %vm3503_vm10, %v2759_v62  ;;  %3172 = vrot.lane.b32.xlu0 %v3417_v22, %s3247_s19  ;;  %v919_v4 = vsel %vm918_vm1, %v3079_v26, %v3080_v3  ;;  %v3200_v22 = vld [vmem:[%s4190_s1 + $0x4] ss:$12 sps:$4 sm:$0xff]   ;;  %v920_v28 = vsel %vm918_vm1, %v3080_v3, %v3084_v5 }
  0xf2   :  { %v3088_v14 = vpop.permute.xlu0 %3087  ;;  %3182 = vrot.lane.b32.xlu1 %v3428_v25, %s3247_s19  ;;  %1427 = vmatprep.mubr.bf16.mxu0 %v3200_v22 }
  0xf3   :  { %v3090_v8 = vunpack.i.h.bf16 %v3088_v14  ;;  %v3089_v13 = vunpack.i.l.bf16 %v3088_v14  ;;  %v3093_v20 = vpop.permute.xlu1 %3092  ;;  %1616 = vmatprep.mubr.bf16.mxu1 %v3200_v22 }
  0xf4   :  { %v3095_v24 = vunpack.i.h.bf16 %v3093_v20  ;;  %v3094_v18 = vunpack.i.l.bf16 %v3093_v20 }
  0xf5   :  { %v921_v29 = vsel %vm918_vm1, %v3085_v19, %v3089_v13  ;;  %v922_v25 = vsel %vm918_vm1, %v3089_v13, %v3090_v8  ;;  %3187 = vrot.lane.b32.xlu0 %v3514_v60, %s3247_s19 }
  0xf6   :  { %v3098_v30 = vpop.permute.xlu0 %3097  ;;  %v2690_v32 = vpack.c.bf16 %v922_v25, %v920_v28  ;;  %v2693_v33 = vpack.c.bf16 %v921_v29, %v919_v4  ;;  %3192 = vrot.lane.b32.xlu1 %v3518_v61, %s3247_s19  ;;  %v923_v61 = vsel %vm918_vm1, %v3094_v18, %v3095_v24 }
  0xf7   :  { %v3100_v35 = vunpack.i.h.bf16 %v3098_v30  ;;  %v3099_v36 = vunpack.i.l.bf16 %v3098_v30  ;;  %v3103_v16 = vpop.permute.xlu1 %3102 }
  0xf8   :  { %v3105_v7 = vunpack.i.h.bf16 %v3103_v16  ;;  %v3104_v37 = vunpack.i.l.bf16 %v3103_v16  ;;  %2691 = vmatprep.subr.msk.bf16.mxu0 %vm3543_vm14, %v2690_v32 }
  0xf9   :  { %v924_v60 = vsel %vm918_vm1, %v3095_v24, %v3099_v36  ;;  %2694 = vmatpush1.bf16.msk.msra.mxu0 %vm3550_vm15, %v2693_v33  ;;  %1815 = vbcast.lane.b32.xlu0 %v1813_v21, 256 }
  0xfa   :  { %v925_v38 = vsel %vm918_vm1, %v3105_v7, %v3100_v35  ;;  %v926_v39 = vsel %vm918_vm1, %v3100_v35, %v3104_v37  ;;  %v978_v41 = vpop.permute.xlu0 %977  ;;  %1819 = vbcast.lane.b32.xlu1 %v1813_v21, 264 }
  0xfb   :  { %v980_v43 = vpop.permute.xlu1 %979  ;;  %v2762_v45 = vpack.c.bf16 %v926_v39, %v924_v60  ;;  %v2765_v31 = vpack.c.bf16 %v925_v38, %v923_v61 }
  0xfc   :  { %v989_v6 = vsel %vm987_vm2, %v978_v41, %v980_v43 }
  0xfd   :  { %1419 = vmatprep.subr.bf16.mxu0 %v989_v6  ;;  %2763 = vmatprep.subr.msk.bf16.mxu1 %vm3543_vm14, %v2762_v45  ;;  %vm1129_vm14 = vcmask 801792  }
  0xfe   :  { %2766 = vmatpush1.bf16.msk.msra.mxu1 %vm3550_vm15, %v2765_v31  ;;  %v984_v12 = vpop.permute.xlu0 %983  ;;  %1826 = vbcast.lane.b32.xlu0 %v1824_v42, 256  ;;  %vm1198_vm15 = vcmask 785408  }
  0xff   :  { %v986_v49 = vpop.permute.xlu1 %985  ;;  %1830 = vbcast.lane.b32.xlu1 %v1824_v42, 264 }
 0x100   :  { %v991_v34 = vsel %vm987_vm2, %v984_v12, %v986_v49 }
 0x101   :  { %1608 = vmatprep.subr.bf16.mxu1 %v991_v34 }
 0x102   :  { %v976_v52 = vpop.permute.xlu0 %975 }
 0x103   :  { %v982_v0 = vpop.permute.xlu1 %981  ;;  %v988_v1 = vsel %vm987_vm2, %v976_v52, %v978_v41 }
 0x104   :  { %1420 = vmatpush1.bf16.msra.mxu0 %v988_v1  ;;  %v990_v54 = vsel %vm987_vm2, %v982_v0, %v984_v12 }
 0x105   :  { %1609 = vmatpush1.bf16.msra.mxu1 %v990_v54 }
 0x106   :  { %v3108_v40 = vpop.permute.xlu0 %3107 }
 0x107   :  { %v3110_v55 = vunpack.i.h.bf16 %v3108_v40  ;;  %v3109_v44 = vunpack.i.l.bf16 %v3108_v40  ;;  %v3113_v17 = vpop.permute.xlu1 %3112 }
 0x108   :  { %v3115_v57 = vunpack.i.h.bf16 %v3113_v17  ;;  %v3114_v10 = vunpack.i.l.bf16 %v3113_v17 }
 0x109   :  { %v1050_v11 = vsel %vm1048_vm5, %v3109_v44, %v3110_v55 }
 0x10a   :  { %v1052_v9 = vsel %vm1048_vm5, %v3114_v10, %v3115_v57  ;;  %v3118_v58 = vpop.permute.xlu0 %3117 }
 0x10b   :  { %v3120_v59 = vunpack.i.h.bf16 %v3118_v58  ;;  %v3119_v62 = vunpack.i.l.bf16 %v3118_v58  ;;  %v3123_v26 = vpop.permute.xlu1 %3122  ;;  %v2696_v3 = vpack.c.bf16 %v1052_v9, %v1050_v11 }
 0x10c   :  { %v3125_v5 = vunpack.i.h.bf16 %v3123_v26  ;;  %v3124_v15 = vunpack.i.l.bf16 %v3123_v26 }
 0x10d   :  { %v1054_v14 = vsel %vm1048_vm5, %v3119_v62, %v3120_v59  ;;  %2697 = vmatprep.subr.msk.bf16.mxu0 %vm3586_vm6, %v2696_v3 }
 0x10e   :  { %v1056_v4 = vsel %vm1048_vm5, %v3124_v15, %v3125_v5  ;;  %v3128_v19 = vpop.permute.xlu0 %3127  ;;  %v3198_v5 = vld [vmem:[%s4190_s1] ss:$12 sps:$4 sm:$0xff]  }
 0x10f   :  { %v3130_v8 = vunpack.i.h.bf16 %v3128_v19  ;;  %v3129_v13 = vunpack.i.l.bf16 %v3128_v19  ;;  %v3133_v20 = vpop.permute.xlu1 %3132  ;;  %v2768_v21 = vpack.c.bf16 %v1056_v4, %v1054_v14  ;;  %v3203_v14 = vld [vmem:[%s4190_s1 + $0x18] ss:$12 sps:$4 sm:$0xff]  }
 0x110   :  { %v3135_v22 = vunpack.i.h.bf16 %v3133_v20  ;;  %v3134_v28 = vunpack.i.l.bf16 %v3133_v20 }
 0x111   :  { %v1049_v29 = vsel %vm1048_vm5, %v3129_v13, %v3109_v44  ;;  %v1051_v25 = vsel %vm1048_vm5, %v3130_v8, %v3114_v10  ;;  %2769 = vmatprep.subr.msk.bf16.mxu1 %vm3586_vm6, %v2768_v21  ;;  %vm2363_vm6 = vcmask 1043459  }
 0x112   :  { %v1053_v24 = vsel %vm1048_vm5, %v3134_v28, %v3119_v62  ;;  %v1055_v18 = vsel %vm1048_vm5, %v3135_v22, %v3124_v15  ;;  %v3138_v30 = vpop.permute.xlu0 %3137  ;;  %v2699_v32 = vpack.c.bf16 %v1051_v25, %v1049_v29 }
 0x113   :  { %v3140_v33 = vunpack.i.h.bf16 %v3138_v30  ;;  %v3139_v35 = vunpack.i.l.bf16 %v3138_v30  ;;  %v3143_v36 = vpop.permute.xlu1 %3142  ;;  %v2771_v16 = vpack.c.bf16 %v1055_v18, %v1053_v24 }
 0x114   :  { %v3145_v7 = vunpack.i.h.bf16 %v3143_v36  ;;  %v3144_v37 = vunpack.i.l.bf16 %v3143_v36  ;;  %2700 = vmatpush1.bf16.msk.msra.mxu0 %vm3590_vm7, %v2699_v32 }
 0x115   :  { %v1131_v60 = vsel %vm1129_vm14, %v3139_v35, %v3140_v33  ;;  %2772 = vmatpush1.bf16.msk.msra.mxu1 %vm3590_vm7, %v2771_v16  ;;  %vm2365_vm7 = vcmask 1044484  }
 0x116   :  { %v1133_v47 = vsel %vm1129_vm14, %v3144_v37, %v3145_v7  ;;  %v3148_v61 = vpop.permute.xlu0 %3147 }
 0x117   :  { %v3150_v38 = vunpack.i.h.bf16 %v3148_v61  ;;  %v3149_v39 = vunpack.i.l.bf16 %v3148_v61  ;;  %v3153_v41 = vpop.permute.xlu1 %3152  ;;  %v2702_v42 = vpack.c.bf16 %v1133_v47, %v1131_v60 }
 0x118   :  { %v3155_v43 = vunpack.i.h.bf16 %v3153_v41  ;;  %v3154_v45 = vunpack.i.l.bf16 %v3153_v41 }
 0x119   :  { %v1135_v31 = vsel %vm1129_vm14, %v3149_v39, %v3150_v38  ;;  %2703 = vmatprep.subr.msk.bf16.mxu0 %vm3451_vm3, %v2702_v42 }
 0x11a   :  { %v1137_v6 = vsel %vm1129_vm14, %v3154_v45, %v3155_v43  ;;  %v3158_v12 = vpop.permute.xlu0 %3157 }
 0x11b   :  { %v3160_v49 = vunpack.i.h.bf16 %v3158_v12  ;;  %v3159_v50 = vunpack.i.l.bf16 %v3158_v12  ;;  %v3163_v34 = vpop.permute.xlu1 %3162  ;;  %v2774_v52 = vpack.c.bf16 %v1137_v6, %v1135_v31  ;;  %v3204_v6 = vld [vmem:[%s4190_s1 + $0x8] ss:$12 sps:$4 sm:$0xff]  }
 0x11c   :  { %v3165_v0 = vunpack.i.h.bf16 %v3163_v34  ;;  %v3164_v1 = vunpack.i.l.bf16 %v3163_v34 }
 0x11d   :  { %v1130_v54 = vsel %vm1129_vm14, %v3159_v50, %v3139_v35  ;;  %v1132_v40 = vsel %vm1129_vm14, %v3160_v49, %v3144_v37  ;;  %2775 = vmatprep.subr.msk.bf16.mxu1 %vm3451_vm3, %v2774_v52  ;;  %vm1259_vm3 = vcmask 769024  }
 0x11e   :  { %v1134_v55 = vsel %vm1129_vm14, %v3164_v1, %v3149_v39  ;;  %v1136_v44 = vsel %vm1129_vm14, %v3165_v0, %v3154_v45  ;;  %v1189_v17 = vpop.permute.xlu0 %1188  ;;  %v2705_v57 = vpack.c.bf16 %v1132_v40, %v1130_v54 }
 0x11f   :  { %v1191_v10 = vpop.permute.xlu1 %1190  ;;  %v2777_v11 = vpack.c.bf16 %v1136_v44, %v1134_v55 }
 0x120   :  { %2706 = vmatpush1.bf16.msk.msra.mxu0 %vm3456_vm4, %v2705_v57  ;;  %v1200_v9 = vsel %vm1198_vm15, %v1189_v17, %v1191_v10 }
 0x121   :  { %2778 = vmatpush1.bf16.msk.msra.mxu1 %vm3456_vm4, %v2777_v11  ;;  %1425 = vmatprep.subr.bf16.mxu0 %v1200_v9  ;;  %vm1885_vm4 = vcmask 130112  }
 0x122   :  { %v1195_v46 = vpop.permute.xlu0 %1194 }
 0x123   :  { %v1197_v58 = vpop.permute.xlu1 %1196 }
 0x124   :  { %v1202_v59 = vsel %vm1198_vm15, %v1195_v46, %v1197_v58 }
 0x125   :  { %1614 = vmatprep.subr.bf16.mxu1 %v1202_v59 }
 0x126   :  { %v1187_v62 = vpop.permute.xlu0 %1186 }
 0x127   :  { %v1193_v26 = vpop.permute.xlu1 %1192  ;;  %v1199_v3 = vsel %vm1198_vm15, %v1187_v62, %v1189_v17  ;;  %v1880_v62 = vadd.s32 4294967288, %v3433_v27 }
 0x128   :  { %1426 = vmatpush1.bf16.msra.mxu0 %v1199_v3  ;;  %v1201_v15 = vsel %vm1198_vm15, %v1193_v26, %v1195_v46 }
 0x129   :  { %1615 = vmatpush1.bf16.msra.mxu1 %v1201_v15 }
 0x12b   :  { %1428 = vmatmul.mubr.bf16.vlgmr.msra.gmra.mrb[0].mxu0 %v3198_v5 }
 0x12c   :  { %1617 = vmatmul.mubr.bf16.vlgmr.msra.gmra.mrb[0].mxu1 %v3198_v5  ;;  %1437 = vmatprep.mubr.bf16.mxu0 %v3201_v51  ;;  %v3812_v5 = vsub.s32 %v3433_v27, %v3673_v56 }
 0x12d   :  { %1626 = vmatprep.mubr.bf16.mxu1 %v3201_v51 }
 0x133   :  { %1438 = vmatmul.mubr.bf16.gmra.mrb[4].mxu0 %v3203_v14 }
 0x134   :  { %1627 = vmatmul.mubr.bf16.gmra.mrb[4].mxu1 %v3203_v14  ;;  %1480 = vmatprep.mubr.bf16.mxu0 %v3248_v2 }
 0x135   :  { %1669 = vmatprep.mubr.bf16.mxu1 %v3248_v2 }
 0x160   :  { %v1793_v4 = vpop.xlane.xlu0 %1792 }
 0x161   :  { %v1804_v37 = vmul.f32 0.00390625, %v1793_v4 }
 0x164   :  { %v1799_v19 = vpop.xlane.xlu0 %1798 }
 0x165   :  { %v1806_v11 = vmul.f32 0.00390625, %v1799_v19 }
 0x166   :  { %v1796_v8 = vpop.xlane.xlu1 %1795 }
 0x167   :  { %v1805_v52 = vmul.f32 0.00390625, %v1796_v8 }
 0x168   :  { %v1802_v13 = vpop.xlane.xlu0 %1801 }
 0x169   :  { %v1807_v9 = vmul.f32 0.00390625, %v1802_v13 }
 0x16a   :  { %v3168_v20 = vpop.permute.xlu1 %3167 }
 0x16b   :  { %v3170_v21 = vunpack.i.h.bf16 %v3168_v20  ;;  %v3169_v22 = vunpack.i.l.bf16 %v3168_v20 }
 0x16c   :  { %v3173_v28 = vpop.permute.xlu0 %3172 }
 0x16d   :  { %v3175_v29 = vunpack.i.h.bf16 %v3173_v28  ;;  %v3174_v25 = vunpack.i.l.bf16 %v3173_v28  ;;  %v1261_v18 = vsel %vm1259_vm3, %v3169_v22, %v3170_v21 }
 0x16e   :  { %v3178_v24 = vpop.permute.xlu1 %3177 }
 0x16f   :  { %v1263_v30 = vsel %vm1259_vm3, %v3174_v25, %v3175_v29  ;;  %v3180_v35 = vunpack.i.h.bf16 %v3178_v24  ;;  %v3179_v36 = vunpack.i.l.bf16 %v3178_v24 }
 0x170   :  { %v2708_v32 = vpack.c.bf16 %v1263_v30, %v1261_v18  ;;  %v3188_v33 = vpop.permute.xlu0 %3187 }
 0x171   :  { %v3190_v16 = vunpack.i.h.bf16 %v3188_v33  ;;  %v3189_v7 = vunpack.i.l.bf16 %v3188_v33  ;;  %v1265_v43 = vsel %vm1259_vm3, %v3179_v36, %v3180_v35 }
 0x172   :  { %v3183_v60 = vpop.permute.xlu1 %3182  ;;  %2709 = vmatprep.subr.msk.bf16.mxu0 %vm3496_vm9, %v2708_v32 }
 0x173   :  { %v1260_v47 = vsel %vm1259_vm3, %v3189_v7, %v3169_v22  ;;  %v1262_v61 = vsel %vm1259_vm3, %v3190_v16, %v3174_v25  ;;  %v3185_v38 = vunpack.i.h.bf16 %v3183_v60  ;;  %v3184_v39 = vunpack.i.l.bf16 %v3183_v60  ;;  %v2628_v7 = vld [vmem:[%s4191_s6] ss:$0 sm:$0xff] }
 0x174   :  { %v2711_v41 = vpack.c.bf16 %v1262_v61, %v1260_v47  ;;  %v1816_v42 = vpop.permute.xlu0 %1815  ;;  %v1300_v60 = vld [vmem:[%s4193_s2] sm:$0xff]  ;;  %v1941_v61 = vld [vmem:[%s4192_s7 + $0x8] sm:$0xff] }
 0x175   :  { %v1267_v45 = vsel %vm1259_vm3, %v3184_v39, %v3185_v38  ;;  %v1836_v31 = vmul.f32 %v1816_v42, %v1804_v37  ;;  %v1840_v53 = vmul.f32 %v1816_v42, %v1806_v11  ;;  %v2003_v42 = vrot.slane %v1941_v61, %v3688_v63 }
 0x176   :  { %v3193_v12 = vpop.permute.xlu1 %3192  ;;  %2712 = vmatpush1.bf16.msk.msra.mxu0 %vm3503_vm10, %v2711_v41  ;;  %v2780_v49 = vpack.c.bf16 %v1267_v45, %v1265_v43  ;;  %v1960_v41 = vsub.s32 2, %v3673_v56  ;;  %v1967_v45 = vsub.s32 3, %v3673_v56 }
 0x177   :  { %v3195_v50 = vunpack.i.h.bf16 %v3193_v12  ;;  %v3194_v34 = vunpack.i.l.bf16 %v3193_v12  ;;  %1853 = vperm.xlu0 %3196, %v1836_v31   ;;  %v1974_v12 = vsub.s32 4, %v3673_v56 }
 0x178   :  { %2781 = vmatprep.subr.msk.bf16.mxu1 %vm3496_vm9, %v2780_v49  ;;  %v1827_v44 = vpop.permute.xlu0 %1826  ;;  %vm1914_vm9 = vcmask 1041409   ;;  %v2017_v43 = vrot.slane %v1941_v61, %v1960_v41 }
 0x179   :  { %v1264_v0 = vsel %vm1259_vm3, %v3194_v34, %v3179_v36  ;;  %v1266_v1 = vsel %vm1259_vm3, %v3195_v50, %v3184_v39  ;;  %2624 = vmatmul.mubr.msk.bf16.vlgmr.msra.gmra.mrb[0].mxu0 %vm432_vm0, %v3204_v6  ;;  %v1838_v57 = vmul.f32 %v1827_v44, %v1804_v37  ;;  %v1842_v58 = vmul.f32 %v1827_v44, %v1806_v11  ;;  %v1940_v37 = vld [vmem:[%s4192_s7] sm:$0xff] }
 0x17a   :  { %v2783_v54 = vpack.c.bf16 %v1266_v1, %v1264_v0  ;;  %v1820_v40 = vpop.permute.xlu1 %1819  ;;  %1490 = vmatprep.mubr.bf16.mxu0 %v3248_v2  ;;  %v1954_v47 = vrot.slane %v1940_v37, %v3702_v23  ;;  %v1947_v38 = vrot.slane %v1940_v37, %v3688_v63  ;;  %v2010_v39 = vrot.slane %v1941_v61, %v3702_v23 }
 0x17b   :  { %v1837_v55 = vmul.f32 %v1820_v40, %v1805_v52  ;;  %v1841_v46 = vmul.f32 %v1820_v40, %v1807_v9  ;;  %v1961_v31 = vrot.slane %v1940_v37, %v1960_v41  ;;  %v1968_v49 = vrot.slane %v1940_v37, %v1967_v45 }
 0x17c   :  { %2784 = vmatpush1.bf16.msk.msra.mxu1 %vm3503_vm10, %v2783_v54  ;;  %vm1919_vm10 = vcmask 123904   ;;  %v2031_v50 = vrot.slane %v1941_v61, %v1974_v12  ;;  %v1981_v23 = vsub.s32 5, %v3673_v56  ;;  %v1975_v34 = vrot.slane %v1940_v37, %v1974_v12 }
 0x17d   :  { %1856 = vperm.xlu1 %3197, %v1837_v55   ;;  %v1995_v54 = vsub.s32 7, %v3673_v56 }
 0x17e   :  { %v1831_v17 = vpop.permute.xlu1 %1830  ;;  %v2038_v63 = vrot.slane %v1941_v61, %v1981_v23  ;;  %v1982_v0 = vrot.slane %v1940_v37, %v1981_v23 }
 0x17f   :  { %v1839_v10 = vmul.f32 %v1831_v17, %v1805_v52  ;;  %2626 = vmatmul.mubr.msk.bf16.vlgmr.msra.gmra.mrb[0].mxu1 %vm432_vm0, %v3204_v6  ;;  %v1843_v59 = vmul.f32 %v1831_v17, %v1807_v9  ;;  %v2024_v6 = vrot.slane %v1941_v61, %v1967_v45  ;;  %v1988_v52 = vsub.s32 6, %v3673_v56  ;;  %v1302_v17 = vld [vmem:[%s4193_s2 + $0x10] sm:$0xff] }
 0x180   :  { %1679 = vmatprep.mubr.bf16.mxu1 %v3248_v2  ;;  %v1883_v2 = vsub.s32 %v1880_v62, %v3673_v56  ;;  %v2052_v55 = vrot.slane %v1941_v61, %v1995_v54  ;;  %v1996_v44 = vrot.slane %v1940_v37, %v1995_v54  ;;  %v1303_v56 = vld [vmem:[%s4193_s2 + $0x18] sm:$0xff] }
 0x181   :  { %1859 = vperm.xlu1 %3197, %v1838_v57   ;;  %1862 = vperm.xlu0 %3196, %v1839_v10   ;;  %v2045_v1 = vrot.slane %v1941_v61, %v1988_v52  ;;  %v1989_v40 = vrot.slane %v1940_v37, %v1988_v52 }
 0x182   :  { %2625 = vmatmul.mubr.msk.bf16.gmra.mrb[4].mxu0 %vm432_vm0, %v3205_v48 }
 0x185   :  { %1865 = vperm.xlu1 %3197, %v1840_v53   ;;  %1868 = vperm.xlu0 %3196, %v1841_v46  }
 0x187   :  { %2627 = vmatmul.mubr.msk.bf16.gmra.mrb[4].mxu1 %vm432_vm0, %v3205_v48  ;;  %v1301_v48 = vld [vmem:[%s4193_s2 + $0x8] sm:$0xff]  ;;  %vm2361_vm0 = vcmask 1042434  }
 0x189   :  { %1871 = vperm.xlu1 %3197, %v1842_v58   ;;  %1874 = vperm.xlu0 %3196, %v1843_v59  }
 0x1f6   :  { %v1854_v26 = vpop.permute.xlu0 %1853 }
 0x1f7   :  { %v1879_v4 = vrot.slane %v1854_v26, %v3812_v5 }
 0x1fc   :  { %v1857_v3 = vpop.permute.xlu1 %1856 }
 0x1fd   :  { %v1884_v15 = vrot.slane %v1857_v3, %v1883_v2 }
 0x1ff   :  { %v1886_v13 = vsel %vm1885_vm4, %v1884_v15, %v1879_v4 }
 0x200   :  { %v1863_v51 = vpop.permute.xlu0 %1862  ;;  %v1860_v14 = vpop.permute.xlu1 %1859 }
 0x201   :  { %v1894_v19 = vrot.slane %v1863_v51, %v1883_v2  ;;  %v1890_v8 = vrot.slane %v1860_v14, %v3812_v5 }
 0x203   :  { %v1895_v20 = vsel %vm1885_vm4, %v1894_v19, %v1890_v8 }
 0x204   :  { %v1869_v21 = vpop.permute.xlu0 %1868  ;;  %v1866_v22 = vpop.permute.xlu1 %1865  ;;  %v1915_v27 = vsel %vm1914_vm9, %v1895_v20, %v1886_v13 }
 0x205   :  { %v1920_v28 = vsel %vm1919_vm10, %v1915_v27, 0.0  ;;  %v1903_v29 = vrot.slane %v1869_v21, %v1883_v2  ;;  %v1899_v25 = vrot.slane %v1866_v22, %v3812_v5 }
 0x206   :  { %1921 = vadd.xlane.f32.xlu0 %v1920_v28 }
 0x207   :  { %v1904_v33 = vsel %vm1885_vm4, %v1903_v29, %v1899_v25 }
 0x208   :  { %v1875_v24 = vpop.permute.xlu0 %1874  ;;  %v1872_v18 = vpop.permute.xlu1 %1871 }
 0x209   :  { %v1912_v30 = vrot.slane %v1875_v24, %v1883_v2  ;;  %v1908_v32 = vrot.slane %v1872_v18, %v3812_v5 }
 0x20b   :  { %v1913_v35 = vsel %vm1885_vm4, %v1912_v30, %v1908_v32 }
 0x20c   :  { %v1916_v36 = vsel %vm1914_vm9, %v1913_v35, %v1904_v33 }
 0x20d   :  { %v1923_v16 = vsel %vm1919_vm10, %v1916_v36, 0.0 }
 0x20e   :  { %1924 = vadd.xlane.f32.xlu1 %v1923_v16 }
 0x21c   :  { %1933 = vbcast.lane.b32.xlu0 %v2628_v7, 256 }
 0x21f   :  { %1340 = vperm.xlu1 %3197, %v1300_v60  }
 0x220   :  { %1956 = vbcast.lane.b32.xlu0 %v1954_v47, 256 }
 0x223   :  { %1949 = vbcast.lane.b32.xlu1 %v1947_v38, 256 }
 0x224   :  { %2012 = vbcast.lane.b32.xlu0 %v2010_v39, 256 }
 0x227   :  { %2005 = vbcast.lane.b32.xlu1 %v2003_v42, 256 }
 0x228   :  { %2019 = vbcast.lane.b32.xlu0 %v2017_v43, 256 }
 0x22b   :  { %1963 = vbcast.lane.b32.xlu1 %v1961_v31, 256 }
 0x22c   :  { %2026 = vbcast.lane.b32.xlu0 %v2024_v6, 256 }
 0x22f   :  { %1970 = vbcast.lane.b32.xlu1 %v1968_v49, 256 }
 0x230   :  { %2033 = vbcast.lane.b32.xlu0 %v2031_v50, 256 }
 0x233   :  { %1977 = vbcast.lane.b32.xlu1 %v1975_v34, 256 }
 0x234   :  { %2040 = vbcast.lane.b32.xlu0 %v2038_v63, 256 }
 0x237   :  { %1984 = vbcast.lane.b32.xlu1 %v1982_v0, 256 }
 0x238   :  { %2047 = vbcast.lane.b32.xlu0 %v2045_v1, 256 }
 0x23b   :  { %1991 = vbcast.lane.b32.xlu1 %v1989_v40, 256 }
 0x23c   :  { %2054 = vbcast.lane.b32.xlu0 %v2052_v55, 256 }
 0x23f   :  { %1998 = vbcast.lane.b32.xlu1 %v1996_v44, 256 }
 0x240   :  { %1350 = vperm.xlu0 %3196, %v1302_v17  }
 0x243   :  { %1345 = vperm.xlu1 %3197, %v1301_v48  }
 0x247   :  { %1355 = vperm.xlu1 %3197, %v1303_v56  }
 0x24c   :  { %v1482_v57 = vpop.f32.mrb[0].mxu0 }
 0x24d   :  { %v1484_v10 = vpop.f32.mrb[1].mxu0 }
 0x24e   :  { %v3857_v11 = vpop.f32.mrb[2].mxu0 }
 0x24f   :  { %v3859_v9 = vpop.f32.mrb[3].mxu0 }
 0x252   :  { %v1671_v53 = vpop.f32.mrb[0].mxu1 }
 0x253   :  { %v1673_v46 = vpop.f32.mrb[1].mxu1 }
 0x254   :  { %v3861_v58 = vpop.f32.mrb[2].mxu1 }
 0x255   :  { %v3863_v59 = vpop.f32.mrb[4].mxu0  ;;  %v3865_v62 = vpop.f32.mrb[3].mxu1 }
 0x256   :  { %v3867_v2 = vpop.f32.mrb[5].mxu0 }
 0x257   :  { %v3869_v26 = vpop.f32.mrb[6].mxu0 }
 0x258   :  { %v3871_v3 = vpop.f32.mrb[7].mxu0 }
 0x25a   :  { %v3873_v15 = vpop.f32.mrb[4].mxu1 }
 0x25b   :  { %v3875_v51 = vpop.f32.mrb[5].mxu1 }
 0x25c   :  { %v3877_v14 = vpop.f32.mrb[6].mxu1 }
 0x25d   :  { %v3879_v4 = vpop.f32.mrb[7].mxu1 }
 0x293   :  { %v1922_v19 = vpop.xlane.xlu0 %1921 }
 0x297   :  { %v1934_v8 = vpop.permute.xlu0 %1933 }
 0x298   :  { %v1936_v20 = vadd.f32 %v1934_v8, %v1922_v19 }
 0x29a   :  { %v3889_v25 = vmax.f32 %v1936_v20, 0.0 }
 0x29b   :  { %v1925_v13 = vpop.xlane.xlu1 %1924  ;;  %v1957_v32 = vpop.permute.xlu0 %1956 }
 0x29c   :  { %v2073_v33 = vmul.f32 %v1957_v32, %v3889_v25  ;;  %v1937_v7 = vadd.f32 %v1934_v8, %v1925_v13 }
 0x29e   :  { %v3897_v60 = vmax.f32 %v1937_v7, 0.0 }
 0x29f   :  { %v1341_v21 = vpop.permute.xlu1 %1340  ;;  %v2013_v36 = vpop.permute.xlu0 %2012 }
 0x2a0   :  { %v3881_v22 = vadd.f32 %v1482_v57, %v1341_v21  ;;  %v3883_v27 = vadd.f32 %v1671_v53, %v1341_v21  ;;  %v3885_v28 = vadd.f32 %v1484_v10, %v1341_v21  ;;  %v3887_v29 = vadd.f32 %v1673_v46, %v1341_v21 }
 0x2a1   :  { %v2081_v37 = vmul.f32 %v2013_v36, %v3889_v25  ;;  %v2089_v41 = vmul.f32 %v1957_v32, %v3897_v60  ;;  %v2097_v6 = vmul.f32 %v2013_v36, %v3897_v60 }
 0x2a2   :  { %v1501_v18 = vadd.f32 %v3885_v28, %v3881_v22 }
 0x2a3   :  { %v1950_v24 = vpop.permute.xlu1 %1949  ;;  %v2020_v47 = vpop.permute.xlu0 %2019 }
 0x2a4   :  { %v2072_v30 = vmul.f32 %v1950_v24, %v3889_v25  ;;  %1502 = vadd.xlane.f32.xlu0 %v1501_v18  ;;  %v2088_v61 = vmul.f32 %v1950_v24, %v3897_v60  ;;  %v2082_v49 = vmul.f32 %v2020_v47, %v3889_v25  ;;  %v2098_v52 = vmul.f32 %v2020_v47, %v3897_v60 }
 0x2a6   :  { %2137 = vperm.xlu1 %3197, %v2072_v30  }
 0x2a7   :  { %v2006_v35 = vpop.permute.xlu1 %2005  ;;  %v2027_v39 = vpop.permute.xlu0 %2026 }
 0x2a8   :  { %v2080_v16 = vmul.f32 %v2006_v35, %v3889_v25  ;;  %v2096_v43 = vmul.f32 %v2006_v35, %v3897_v60  ;;  %v2099_v45 = vmul.f32 %v2027_v39, %v3897_v60  ;;  %v2083_v44 = vmul.f32 %v2027_v39, %v3889_v25 }
 0x2a9   :  { %v1517_v39 = vmul.f32 %v3881_v22, %v3881_v22 }
 0x2aa   :  { %2140 = vperm.xlu1 %3197, %v2073_v33  }
 0x2ab   :  { %v1964_v38 = vpop.permute.xlu1 %1963  ;;  %v2034_v31 = vpop.permute.xlu0 %2033 }
 0x2ac   :  { %v2074_v42 = vmul.f32 %v1964_v38, %v3889_v25  ;;  %v2084_v12 = vmul.f32 %v2034_v31, %v3889_v25  ;;  %v2100_v50 = vmul.f32 %v2034_v31, %v3897_v60  ;;  %v2090_v34 = vmul.f32 %v1964_v38, %v3897_v60 }
 0x2ae   :  { %2161 = vperm.xlu1 %3197, %v2080_v16  }
 0x2af   :  { %v2041_v23 = vpop.permute.xlu0 %2040  ;;  %v1971_v1 = vpop.permute.xlu1 %1970 }
 0x2b0   :  { %v2085_v63 = vmul.f32 %v2041_v23, %v3889_v25  ;;  %v2101_v0 = vmul.f32 %v2041_v23, %v3897_v60  ;;  %v2075_v40 = vmul.f32 %v1971_v1, %v3889_v25  ;;  %v2091_v56 = vmul.f32 %v1971_v1, %v3897_v60 }
 0x2b2   :  { %2164 = vperm.xlu1 %3197, %v2081_v37  }
 0x2b3   :  { %v2048_v54 = vpop.permute.xlu0 %2047  ;;  %v1978_v57 = vpop.permute.xlu1 %1977 }
 0x2b4   :  { %v2086_v55 = vmul.f32 %v2048_v54, %v3889_v25  ;;  %v2102_v17 = vmul.f32 %v2048_v54, %v3897_v60  ;;  %v2076_v53 = vmul.f32 %v1978_v57, %v3889_v25  ;;  %v2092_v19 = vmul.f32 %v1978_v57, %v3897_v60 }
 0x2b6   :  { %2185 = vperm.xlu1 %3197, %v2088_v61  }
 0x2b7   :  { %v2055_v48 = vpop.permute.xlu0 %2054  ;;  %v1985_v8 = vpop.permute.xlu1 %1984 }
 0x2b8   :  { %v2087_v10 = vmul.f32 %v2055_v48, %v3889_v25  ;;  %v2103_v46 = vmul.f32 %v2055_v48, %v3897_v60  ;;  %v2077_v13 = vmul.f32 %v1985_v8, %v3889_v25  ;;  %v2093_v21 = vmul.f32 %v1985_v8, %v3897_v60 }
 0x2ba   :  { %2188 = vperm.xlu1 %3197, %v2089_v41   ;;  %2143 = vperm.xlu0 %3196, %v2074_v42   ;;  %v1707_v42 = vmul.f32 %v3887_v29, %v3887_v29 }
 0x2bb   :  { %v1992_v20 = vpop.permute.xlu1 %1991 }
 0x2bc   :  { %v2078_v24 = vmul.f32 %v1992_v20, %v3889_v25  ;;  %v2094_v30 = vmul.f32 %v1992_v20, %v3897_v60 }
 0x2be   :  { %2209 = vperm.xlu1 %3197, %v2096_v43   ;;  %2218 = vperm.xlu0 %3196, %v2099_v45   ;;  %v1706_v45 = vmul.f32 %v3883_v27, %v3883_v27 }
 0x2bf   :  { %v1999_v18 = vpop.permute.xlu1 %1998  ;;  %v1351_v35 = vpop.permute.xlu0 %1350 }
 0x2c0   :  { %v2079_v33 = vmul.f32 %v1999_v18, %v3889_v25  ;;  %v3927_v36 = vadd.f32 %v3863_v59, %v1351_v35  ;;  %v3930_v16 = vadd.f32 %v3867_v2, %v1351_v35  ;;  %v2095_v7 = vmul.f32 %v1999_v18, %v3897_v60 }
 0x2c1   :  { %v3944_v2 = vadd.f32 %v3873_v15, %v1351_v35  ;;  %v3947_v60 = vadd.f32 %v3875_v51, %v1351_v35 }
 0x2c2   :  { %2212 = vperm.xlu1 %3197, %v2097_v6   ;;  %2173 = vperm.xlu0 %3196, %v2084_v12   ;;  %v1507_v25 = vadd.f32 %v3930_v16, %v3927_v36  ;;  %v1521_v15 = vmul.f32 %v3927_v36, %v3927_v36  ;;  %v1522_v51 = vmul.f32 %v3930_v16, %v3930_v16 }
 0x2c3   :  { %v1346_v32 = vpop.permute.xlu1 %1345  ;;  %v1696_v38 = vadd.f32 %v3947_v60, %v3944_v2  ;;  %v1711_v31 = vmul.f32 %v3947_v60, %v3947_v60  ;;  %v1714_v6 = vadd.f32 %v1707_v42, %v1706_v45  ;;  %v1710_v12 = vmul.f32 %v3944_v2, %v3944_v2 }
 0x2c4   :  { %v1531_v43 = vadd.f32 %v1522_v51, %v1521_v15 }
 0x2c5   :  { %v1720_v23 = vadd.f32 %v1711_v31, %v1710_v12 }
 0x2c6   :  { %2167 = vperm.xlu1 %3197, %v2082_v49   ;;  %2221 = vperm.xlu0 %3196, %v2100_v50   ;;  %v3970_v49 = vadd.f32 %v3857_v11, %v1346_v32  ;;  %v3973_v50 = vadd.f32 %v3859_v9, %v1346_v32 }
 0x2c7   :  { %v1356_v37 = vpop.permute.xlu1 %1355 }
 0x2c8   :  { %v3934_v47 = vadd.f32 %v3869_v26, %v1356_v37  ;;  %v3937_v61 = vadd.f32 %v3871_v3, %v1356_v37  ;;  %v1690_v26 = vadd.f32 %v3887_v29, %v3883_v27  ;;  %v1518_v3 = vmul.f32 %v3885_v28, %v3885_v28 }
 0x2c9   :  { %v3987_v11 = vadd.f32 %v3879_v4, %v1356_v37  ;;  %v1520_v1 = vmul.f32 %v3973_v50, %v3973_v50 }
 0x2ca   :  { %2191 = vperm.xlu1 %3197, %v2090_v34   ;;  %2176 = vperm.xlu0 %3196, %v2085_v63   ;;  %v1510_v59 = vadd.f32 %v3937_v61, %v3934_v47  ;;  %v1525_v41 = vadd.f32 %v1518_v3, %v1517_v39  ;;  %v3976_v34 = vadd.f32 %v3861_v58, %v1346_v32 }
 0x2cb   :  { %v3979_v63 = vadd.f32 %v3865_v62, %v1346_v32  ;;  %v1519_v62 = vmul.f32 %v3970_v49, %v3970_v49  ;;  %v1523_v4 = vmul.f32 %v3934_v47, %v3934_v47 }
 0x2cc   :  { %v1708_v57 = vmul.f32 %v3976_v34, %v3976_v34 }
 0x2cd   :  { %v1693_v9 = vadd.f32 %v3979_v63, %v3976_v34 }
 0x2ce   :  { %2215 = vperm.xlu1 %3197, %v2098_v52   ;;  %2224 = vperm.xlu0 %3196, %v2101_v0   ;;  %v1504_v52 = vadd.f32 %v3973_v50, %v3970_v49  ;;  %v3984_v0 = vadd.f32 %v3877_v14, %v1356_v37  ;;  %v1528_v14 = vadd.f32 %v1520_v1, %v1519_v62 }
 0x2d0   :  { %v1699_v58 = vadd.f32 %v3987_v11, %v3984_v0  ;;  %v1712_v8 = vmul.f32 %v3984_v0, %v3984_v0 }
 0x2d2   :  { %2146 = vperm.xlu1 %3197, %v2075_v40   ;;  %2179 = vperm.xlu0 %3196, %v2086_v55   ;;  %v1524_v40 = vmul.f32 %v3937_v61, %v3937_v61 }
 0x2d6   :  { %2170 = vperm.xlu1 %3197, %v2083_v44   ;;  %2227 = vperm.xlu0 %3196, %v2102_v17  }
 0x2da   :  { %2194 = vperm.xlu1 %3197, %v2091_v56   ;;  %2182 = vperm.xlu0 %3196, %v2087_v10   ;;  %v1534_v56 = vadd.f32 %v1524_v40, %v1523_v4  ;;  %v1709_v10 = vmul.f32 %v3979_v63, %v3979_v63 }
 0x2de   :  { %2149 = vperm.xlu1 %3197, %v2076_v53   ;;  %2230 = vperm.xlu0 %3196, %v2103_v46   ;;  %v1713_v46 = vmul.f32 %v3987_v11, %v3987_v11 }
 0x2e0   :  { %v1723_v20 = vadd.f32 %v1713_v46, %v1712_v8 }
 0x2e2   :  { %2197 = vperm.xlu1 %3197, %v2092_v19   ;;  %v1717_v19 = vadd.f32 %v1709_v10, %v1708_v57 }
 0x2e6   :  { %2152 = vperm.xlu1 %3197, %v2077_v13  }
 0x2ea   :  { %2200 = vperm.xlu1 %3197, %v2093_v21  }
 0x2ee   :  { %2155 = vperm.xlu1 %3197, %v2078_v24  }
 0x2f2   :  { %2203 = vperm.xlu1 %3197, %v2094_v30  }
 0x2f6   :  { %2158 = vperm.xlu1 %3197, %v2079_v33  }
 0x2fa   :  { %2206 = vperm.xlu1 %3197, %v2095_v7  }
 0x2fd   :  { %1508 = vadd.xlane.f32.xlu0 %v1507_v25 }
 0x301   :  { %1511 = vadd.xlane.f32.xlu0 %v1510_v59 }
 0x305   :  { %1691 = vadd.xlane.f32.xlu0 %v1690_v26 }
 0x309   :  { %1697 = vadd.xlane.f32.xlu0 %v1696_v38 }
 0x30d   :  { %1526 = vadd.xlane.f32.xlu0 %v1525_v41 }
 0x311   :  { %1532 = vadd.xlane.f32.xlu0 %v1531_v43 }
 0x315   :  { %1715 = vadd.xlane.f32.xlu0 %v1714_v6 }
 0x319   :  { %1721 = vadd.xlane.f32.xlu0 %v1720_v23 }
 0x31e   :  { %1505 = vadd.xlane.f32.xlu1 %v1504_v52 }
 0x322   :  { %1694 = vadd.xlane.f32.xlu1 %v1693_v9 }
 0x325   :  { %v2138_v54 = vpop.permute.xlu1 %2137 }
 0x326   :  { %1700 = vadd.xlane.f32.xlu1 %v1699_v58  ;;  %v2235_v44 = vrot.slane %v2138_v54, %v3812_v5 }
 0x329   :  { %v2141_v55 = vpop.permute.xlu1 %2140 }
 0x32a   :  { %v2239_v17 = vrot.slane %v2141_v55, %v3812_v5  ;;  %1529 = vadd.xlane.f32.xlu1 %v1528_v14 }
 0x32c   :  { %v4004_v48 = vsel %vm1914_vm9, %v2239_v17, %v2235_v44 }
 0x32d   :  { %v2162_v53 = vpop.permute.xlu1 %2161 }
 0x32e   :  { %1535 = vadd.xlane.f32.xlu1 %v1534_v56  ;;  %v2267_v31 = vrot.slane %v2162_v53, %v3812_v5 }
 0x331   :  { %v2165_v13 = vpop.permute.xlu1 %2164  ;;  %v4016_v24 = vpop.xlane.xlu0 %1502 }
 0x332   :  { %1718 = vadd.xlane.f32.xlu1 %v1717_v19  ;;  %v2271_v15 = vrot.slane %v2165_v13, %v3812_v5 }
 0x334   :  { %v2373_v23 = vsel %vm1914_vm9, %v2271_v15, %v2267_v31 }
 0x335   :  { %v4014_v21 = vpop.permute.xlu1 %2185 }
 0x336   :  { %1724 = vadd.xlane.f32.xlu1 %v1723_v20 }
 0x339   :  { %v4018_v18 = vpop.permute.xlu1 %2188  ;;  %v4020_v30 = vpop.permute.xlu0 %2143 }
 0x33d   :  { %v2210_v32 = vpop.permute.xlu1 %2209  ;;  %v2219_v33 = vpop.permute.xlu0 %2218 }
 0x33e   :  { %v2331_v43 = vrot.slane %v2210_v32, %v3812_v5  ;;  %v2343_v62 = vrot.slane %v2219_v33, %v3812_v5 }
 0x341   :  { %v2213_v35 = vpop.permute.xlu1 %2212  ;;  %v2174_v7 = vpop.permute.xlu0 %2173 }
 0x342   :  { %v2335_v39 = vrot.slane %v2213_v35, %v3812_v5  ;;  %v2283_v1 = vrot.slane %v2174_v7, %v3812_v5 }
 0x344   :  { %v2387_v6 = vsel %vm1914_vm9, %v2335_v39, %v2331_v43 }
 0x345   :  { %v2168_v37 = vpop.permute.xlu1 %2167  ;;  %v2222_v25 = vpop.permute.xlu0 %2221 }
 0x346   :  { %v2275_v45 = vrot.slane %v2168_v37, %v3812_v5  ;;  %v2347_v56 = vrot.slane %v2222_v25, %v3812_v5 }
 0x348   :  { %v2374_v54 = vsel %vm2361_vm0, %v2275_v45, %v2373_v23 }
 0x349   :  { %v4022_v59 = vpop.permute.xlu1 %2191  ;;  %v2177_v26 = vpop.permute.xlu0 %2176 }
 0x34a   :  { %v2287_v14 = vrot.slane %v2177_v26, %v3812_v5 }
 0x34d   :  { %v2216_v3 = vpop.permute.xlu1 %2215  ;;  %v2225_v38 = vpop.permute.xlu0 %2224 }
 0x34e   :  { %v2339_v51 = vrot.slane %v2216_v3, %v3812_v5  ;;  %v2351_v13 = vrot.slane %v2225_v38, %v3812_v5 }
 0x350   :  { %v2388_v52 = vsel %vm2361_vm0, %v2339_v51, %v2387_v6  ;;  %v2303_v6 = vrot.slane %v4018_v18, %v3812_v5 }
 0x351   :  { %v4025_v41 = vpop.permute.xlu1 %2146  ;;  %v2180_v42 = vpop.permute.xlu0 %2179  ;;  %v2389_v40 = vsel %vm2363_vm6, %v2343_v62, %v2388_v52  ;;  %v2307_v52 = vrot.slane %v4022_v59, %v3812_v5 }
 0x352   :  { %v2291_v55 = vrot.slane %v2180_v42, %v3812_v5  ;;  %v2390_v19 = vsel %vm2365_vm7, %v2347_v56, %v2389_v40  ;;  %v2243_v42 = vrot.slane %v4020_v30, %v3812_v5  ;;  %v2247_v43 = vrot.slane %v4025_v41, %v3812_v5 }
 0x353   :  { %v2391_v7 = vsel %vm2367_vm11, %v2351_v13, %v2390_v19  ;;  %v2299_v30 = vrot.slane %v4014_v21, %v3812_v5 }
 0x354   :  { %v2362_v23 = vsel %vm2361_vm0, %v2243_v42, %v4004_v48 }
 0x355   :  { %v2171_v12 = vpop.permute.xlu1 %2170  ;;  %v2228_v58 = vpop.permute.xlu0 %2227  ;;  %v2364_v41 = vsel %vm2363_vm6, %v2247_v43, %v2362_v23 }
 0x356   :  { %v2279_v9 = vrot.slane %v2171_v12, %v3812_v5  ;;  %v2355_v8 = vrot.slane %v2228_v58, %v3812_v5 }
 0x358   :  { %v2375_v4 = vsel %vm2363_vm6, %v2279_v9, %v2374_v54  ;;  %v2392_v25 = vsel %vm2369_vm12, %v2355_v8, %v2391_v7  ;;  %v2380_v54 = vsel %vm1914_vm9, %v2303_v6, %v2299_v30  ;;  %v1755_v30 = vld [vmem:[%s4194_s3] sm:$0xff] }
 0x359   :  { %v2376_v44 = vsel %vm2365_vm7, %v2283_v1, %v2375_v4  ;;  %v2195_v17 = vpop.permute.xlu1 %2194  ;;  %v2183_v57 = vpop.permute.xlu0 %2182  ;;  %v2381_v4 = vsel %vm2361_vm0, %v2307_v52, %v2380_v54 }
 0x35a   :  { %v2377_v10 = vsel %vm2367_vm11, %v2287_v14, %v2376_v44  ;;  %v2295_v53 = vrot.slane %v2183_v57, %v3812_v5  ;;  %v2311_v58 = vrot.slane %v2195_v17, %v3812_v5 }
 0x35b   :  { %v2378_v46 = vsel %vm2369_vm12, %v2291_v55, %v2377_v10 }
 0x35c   :  { %v2379_v32 = vsel %vm2371_vm13, %v2295_v53, %v2378_v46  ;;  %v2382_v55 = vsel %vm2363_vm6, %v2311_v58, %v2381_v4 }
 0x35d   :  { %v2150_v20 = vpop.permute.xlu1 %2149  ;;  %v2231_v33 = vpop.permute.xlu0 %2230  ;;  %v2401_v35 = vsel %vm578_vm8, %v2379_v32, 0.0 }
 0x35e   :  { %v2359_v37 = vrot.slane %v2231_v33, %v3812_v5  ;;  %2402 = vadd.xlane.f32.xlu1 %v2401_v35  ;;  %v2251_v45 = vrot.slane %v2150_v20, %v3812_v5 }
 0x360   :  { %v2393_v3 = vsel %vm2371_vm13, %v2359_v37, %v2392_v25  ;;  %v2366_v62 = vsel %vm2365_vm7, %v2251_v45, %v2364_v41 }
 0x361   :  { %v2198_v26 = vpop.permute.xlu1 %2197  ;;  %v2407_v39 = vsel %vm578_vm8, %v2393_v3, 0.0 }
 0x362   :  { %2408 = vadd.xlane.f32.xlu1 %v2407_v39  ;;  %v2315_v18 = vrot.slane %v2198_v26, %v3812_v5 }
 0x364   :  { %v2383_v17 = vsel %vm2365_vm7, %v2315_v18, %v2382_v55  ;;  %v1771_v18 = vld [vmem:[%s4195_s4] sm:$0xff] }
 0x365   :  { %v2153_v38 = vpop.permute.xlu1 %2152 }
 0x366   :  { %v2255_v12 = vrot.slane %v2153_v38, %v3812_v5 }
 0x368   :  { %v2368_v48 = vsel %vm2367_vm11, %v2255_v12, %v2366_v62 }
 0x369   :  { %v2201_v15 = vpop.permute.xlu1 %2200 }
 0x36a   :  { %v2319_v59 = vrot.slane %v2201_v15, %v3812_v5 }
 0x36c   :  { %v2384_v10 = vsel %vm2367_vm11, %v2319_v59, %v2383_v17 }
 0x36d   :  { %v2156_v51 = vpop.permute.xlu1 %2155 }
 0x36e   :  { %v2259_v9 = vrot.slane %v2156_v51, %v3812_v5 }
 0x370   :  { %v2370_v40 = vsel %vm2369_vm12, %v2259_v9, %v2368_v48 }
 0x371   :  { %v2204_v31 = vpop.permute.xlu1 %2203 }
 0x372   :  { %v2323_v21 = vrot.slane %v2204_v31, %v3812_v5 }
 0x374   :  { %v2385_v46 = vsel %vm2369_vm12, %v2323_v21, %v2384_v10 }
 0x375   :  { %v2159_v1 = vpop.permute.xlu1 %2158 }
 0x376   :  { %v2263_v14 = vrot.slane %v2159_v1, %v3812_v5  ;;  %v1757_v1 = vld [vmem:[%s4194_s3 + $0x10] sm:$0xff] }
 0x378   :  { %v2372_v44 = vsel %vm2371_vm13, %v2263_v14, %v2370_v40  ;;  %v1773_v40 = vld [vmem:[%s4195_s4 + $0x10] sm:$0xff] }
 0x379   :  { %v2207_v56 = vpop.permute.xlu1 %2206  ;;  %v2398_v57 = vsel %vm578_vm8, %v2372_v44, 0.0 }
 0x37a   :  { %v2327_v53 = vrot.slane %v2207_v56, %v3812_v5  ;;  %2399 = vadd.xlane.f32.xlu0 %v2398_v57 }
 0x37c   :  { %v2386_v19 = vsel %vm2371_vm13, %v2327_v53, %v2385_v46 }
 0x37d   :  { %v2404_v8 = vsel %vm578_vm8, %v2386_v19, 0.0 }
 0x37e   :  { %2405 = vadd.xlane.f32.xlu0 %v2404_v8 }
 0x38a   :  { %v1509_v13 = vpop.xlane.xlu0 %1508 }
 0x38e   :  { %v1512_v20 = vpop.xlane.xlu0 %1511 }
 0x392   :  { %v1692_v32 = vpop.xlane.xlu0 %1691 }
 0x393   :  { %v1702_v7 = vadd.f32 %v1692_v32, %v4016_v24 }
 0x395   :  { %v1739_v25 = vmul.f32 0.001953125, %v1702_v7 }
 0x396   :  { %v1698_v33 = vpop.xlane.xlu0 %1697 }
 0x397   :  { %v1704_v26 = vadd.f32 %v1698_v33, %v1509_v13  ;;  %v1747_v39 = vmul.f32 %v1739_v25, %v1739_v25 }
 0x399   :  { %v1741_v38 = vmul.f32 0.001953125, %v1704_v26 }
 0x39a   :  { %v1527_v35 = vpop.xlane.xlu0 %1526 }
 0x39b   :  { %v1749_v45 = vmul.f32 %v1741_v38, %v1741_v38 }
 0x39e   :  { %v1533_v37 = vpop.xlane.xlu0 %1532 }
 0x3a2   :  { %v1716_v3 = vpop.xlane.xlu0 %1715 }
 0x3a3   :  { %v1726_v5 = vadd.f32 %v1716_v3, %v1527_v35 }
 0x3a5   :  { %v1743_v15 = vmul.f32 0.001953125, %v1726_v5  ;;  %v1772_v5 = vld [vmem:[%s4195_s4 + $0x8] sm:$0xff] }
 0x3a6   :  { %v1722_v51 = vpop.xlane.xlu0 %1721 }
 0x3a7   :  { %v1751_v42 = vsub.f32 %v1743_v15, %v1747_v39  ;;  %v1728_v43 = vadd.f32 %v1722_v51, %v1533_v37  ;;  %v1758_v51 = vld [vmem:[%s4194_s3 + $0x18] sm:$0xff] }
 0x3a9   :  { %v1759_v31 = vadd.f32 1e-05, %v1751_v42  ;;  %v1745_v6 = vmul.f32 0.001953125, %v1728_v43 }
 0x3ab   :  { %v1506_v12 = vpop.xlane.xlu1 %1505  ;;  %3206 = vrsqrt.f32 %v1759_v31  ;;  %v1753_v23 = vsub.f32 %v1745_v6, %v1749_v45  ;;  %v1774_v45 = vld [vmem:[%s4195_s4 + $0x18] sm:$0xff]  ;;  %v2411_v6 = vld [vmem:[%s4196_s8 + $0x8] sm:$0xff] }
 0x3ad   :  { %v1761_v52 = vadd.f32 1e-05, %v1753_v23 }
 0x3af   :  { %v1695_v9 = vpop.xlane.xlu1 %1694  ;;  %3208 = vrsqrt.f32 %v1761_v52 }
 0x3b0   :  { %v1703_v59 = vadd.f32 %v1695_v9, %v1506_v12 }
 0x3b2   :  { %v1740_v44 = vmul.f32 0.001953125, %v1703_v59 }
 0x3b3   :  { %v1701_v24 = vpop.xlane.xlu1 %1700 }
 0x3b4   :  { %v1705_v17 = vadd.f32 %v1701_v24, %v1512_v20  ;;  %v1748_v53 = vmul.f32 %v1740_v44, %v1740_v44  ;;  %v1756_v20 = vld [vmem:[%s4194_s3 + $0x8] sm:$0xff] }
 0x3b5   :  { %v3207_v41 = vpop.eup %3206 }
 0x3b6   :  { %v1767_v62 = vmul.f32 %v3207_v41, %v1755_v30  ;;  %v1742_v46 = vmul.f32 0.001953125, %v1705_v17 }
 0x3b7   :  { %v1530_v58 = vpop.xlane.xlu1 %1529 }
 0x3b8   :  { %2450 = vperm.xlu0 %3196, %v1767_v62   ;;  %v1775_v54 = vmul.f32 %v1767_v62, %v1739_v25  ;;  %v1750_v33 = vmul.f32 %v1742_v46, %v1742_v46 }
 0x3b9   :  { %v3209_v48 = vpop.eup %3208 }
 0x3ba   :  { %v1779_v4 = vsub.f32 %v1771_v18, %v1775_v54  ;;  %v1769_v21 = vmul.f32 %v3209_v48, %v1757_v1  ;;  %v2410_v1 = vld [vmem:[%s4196_s8] sm:$0xff] }
 0x3bb   :  { %v1536_v14 = vpop.xlane.xlu1 %1535 }
 0x3bc   :  { %2464 = vperm.xlu0 %3196, %v1779_v4   ;;  %v1777_v55 = vmul.f32 %v1769_v21, %v1741_v38 }
 0x3be   :  { %v1781_v57 = vsub.f32 %v1773_v40, %v1777_v55 }
 0x3bf   :  { %v1719_v56 = vpop.xlane.xlu1 %1718 }
 0x3c0   :  { %v1727_v10 = vadd.f32 %v1719_v56, %v1530_v58  ;;  %2496 = vperm.xlu0 %3196, %v1781_v57  }
 0x3c2   :  { %v1744_v19 = vmul.f32 0.001953125, %v1727_v10 }
 0x3c3   :  { %v1725_v8 = vpop.xlane.xlu1 %1724 }
 0x3c4   :  { %v1752_v13 = vsub.f32 %v1744_v19, %v1748_v53  ;;  %v1729_v32 = vadd.f32 %v1725_v8, %v1536_v14 }
 0x3c6   :  { %v1760_v35 = vadd.f32 1e-05, %v1752_v13  ;;  %v1746_v7 = vmul.f32 0.001953125, %v1729_v32 }
 0x3c8   :  { %3210 = vrsqrt.f32 %v1760_v35  ;;  %v1754_v37 = vsub.f32 %v1746_v7, %v1750_v33 }
 0x3ca   :  { %v1762_v25 = vadd.f32 1e-05, %v1754_v37 }
 0x3cc   :  { %3212 = vrsqrt.f32 %v1762_v25 }
 0x3d2   :  { %v3211_v26 = vpop.eup %3210 }
 0x3d3   :  { %v1768_v3 = vmul.f32 %v3211_v26, %v1756_v20 }
 0x3d5   :  { %2455 = vperm.xlu1 %3197, %v1768_v3   ;;  %v1776_v39 = vmul.f32 %v1768_v3, %v1740_v44 }
 0x3d6   :  { %v3213_v15 = vpop.eup %3212 }
 0x3d7   :  { %v1780_v38 = vsub.f32 %v1772_v5, %v1776_v39  ;;  %v1770_v42 = vmul.f32 %v3213_v15, %v1758_v51 }
 0x3d9   :  { %2469 = vperm.xlu1 %3197, %v1780_v38   ;;  %v1778_v43 = vmul.f32 %v1770_v42, %v1742_v46 }
 0x3db   :  { %v1782_v31 = vsub.f32 %v1774_v45, %v1778_v43 }
 0x3dd   :  { %2482 = vperm.xlu1 %3197, %v1769_v21  }
 0x3e1   :  { %2487 = vperm.xlu1 %3197, %v1770_v42  }
 0x3e5   :  { %2501 = vperm.xlu1 %3197, %v1782_v31  }
 0x3eb   :  { %v2403_v12 = vpop.xlane.xlu1 %2402 }
 0x3ec   :  { %v2413_v23 = vadd.f32 %v2411_v6, %v2403_v12 }
 0x3ee   :  { %v2630_v52 = vmul.f32 -1.442695, %v2413_v23 }
 0x3ef   :  { %v2409_v9 = vpop.xlane.xlu1 %2408 }
 0x3f0   :  { %3214 = vpow2.f32 %v2630_v52  ;;  %v2415_v24 = vadd.f32 %v2411_v6, %v2409_v9 }
 0x3f2   :  { %v2632_v30 = vmul.f32 -1.442695, %v2415_v24 }
 0x3f4   :  { %3216 = vpow2.f32 %v2632_v30  ;;  %v2635_v30 = vld [vmem:[%s4188_s0 + $0x30] sm:$0xff] }
 0x3fa   :  { %v3215_v41 = vpop.eup %3214 }
 0x3fb   :  { %v2429_v58 = vadd.f32 1.0, %v3215_v41  ;;  %v2636_v41 = vld [vmem:[%s4188_s0 + $0x38] sm:$0xff] }
 0x3fd   :  { %3218 = vrcp.f32 %v2429_v58 }
 0x3fe   :  { %v3217_v62 = vpop.eup %3216 }
 0x3ff   :  { %v2431_v18 = vadd.f32 1.0, %v3217_v62 }
 0x401   :  { %3220 = vrcp.f32 %v2431_v18 }
 0x407   :  { %v2400_v54 = vpop.xlane.xlu0 %2399  ;;  %v3219_v48 = vpop.eup %3218 }
 0x408   :  { %v2412_v59 = vadd.f32 %v2410_v1, %v2400_v54  ;;  %2527 = vperm.xlu1 %3197, %v3219_v48  }
 0x40a   :  { %v2629_v14 = vmul.f32 -1.442695, %v2412_v59 }
 0x40b   :  { %v2406_v4 = vpop.xlane.xlu0 %2405  ;;  %v3221_v21 = vpop.eup %3220 }
 0x40c   :  { %3222 = vpow2.f32 %v2629_v14  ;;  %v2414_v40 = vadd.f32 %v2410_v1, %v2406_v4  ;;  %2594 = vperm.xlu1 %3197, %v3221_v21  }
 0x40e   :  { %v2631_v55 = vmul.f32 -1.442695, %v2414_v40 }
 0x410   :  { %3224 = vpow2.f32 %v2631_v55 }
 0x416   :  { %v3223_v44 = vpop.eup %3222 }
 0x417   :  { %v2428_v17 = vadd.f32 1.0, %v3223_v44 }
 0x419   :  { %3226 = vrcp.f32 %v2428_v17 }
 0x41a   :  { %v3225_v56 = vpop.eup %3224 }
 0x41b   :  { %v2430_v57 = vadd.f32 1.0, %v3225_v56 }
 0x41d   :  { %3228 = vrcp.f32 %v2430_v57 }
 0x423   :  { %v3227_v10 = vpop.eup %3226 }
 0x424   :  { %2522 = vperm.xlu0 %3196, %v3227_v10  }
 0x427   :  { %v3229_v53 = vpop.eup %3228 }
 0x428   :  { %2589 = vperm.xlu0 %3196, %v3229_v53  }
 0x437   :  { %v2451_v21 = vpop.permute.xlu0 %2450 }
 0x43b   :  { %v2465_v56 = vpop.permute.xlu0 %2464 }
 0x43f   :  { %v2497_v53 = vpop.permute.xlu0 %2496 }
 0x454   :  { %v2456_v46 = vpop.permute.xlu1 %2455 }
 0x455   :  { %v2460_v7 = vmul.f32 %v3970_v49, %v2456_v46  ;;  %v2461_v37 = vmul.f32 %v3973_v50, %v2456_v46  ;;  %v2556_v38 = vmul.f32 %v3976_v34, %v2456_v46  ;;  %v2557_v15 = vmul.f32 %v3979_v63, %v2456_v46  ;;  %v2518_v50 = vld [vmem:[%s4188_s0 + $0x10] sm:$0xff] }
 0x458   :  { %v2470_v19 = vpop.permute.xlu1 %2469 }
 0x459   :  { %v2474_v5 = vadd.f32 %v2470_v19, %v2460_v7  ;;  %v2475_v39 = vadd.f32 %v2470_v19, %v2461_v37  ;;  %v2560_v43 = vadd.f32 %v2556_v38, %v2470_v19  ;;  %v2561_v49 = vadd.f32 %v2557_v15, %v2470_v19 }
 0x45b   :  { %v2479_v45 = vmax.f32 %v2475_v39, 0.0  ;;  %v2564_v9 = vmax.f32 %v2560_v43, 0.0  ;;  %v2565_v24 = vmax.f32 %v2561_v49, 0.0  ;;  %v2633_v43 = vld [vmem:[%s4188_s0 + $0x20] sm:$0xff]  ;;  %v2634_v49 = vld [vmem:[%s4188_s0 + $0x28] sm:$0xff] }
 0x45c   :  { %v2483_v8 = vpop.permute.xlu1 %2482 }
 0x45d   :  { %v2490_v57 = vmul.f32 %v3927_v36, %v2483_v8  ;;  %v2491_v10 = vmul.f32 %v3930_v16, %v2483_v8  ;;  %v2566_v46 = vmul.f32 %v3944_v2, %v2483_v8  ;;  %v2567_v19 = vmul.f32 %v3947_v60, %v2483_v8 }
 0x45f   :  { %v2570_v36 = vadd.f32 %v2566_v46, %v2497_v53 }
 0x460   :  { %v2488_v13 = vpop.permute.xlu1 %2487 }
 0x461   :  { %v2492_v33 = vmul.f32 %v3934_v47, %v2488_v13  ;;  %v2493_v35 = vmul.f32 %v3937_v61, %v2488_v13  ;;  %v2568_v26 = vmul.f32 %v3984_v0, %v2488_v13  ;;  %v2569_v3 = vmul.f32 %v3987_v11, %v2488_v13  ;;  %v2519_v0 = vld [vmem:[%s4188_s0 + $0x18] sm:$0xff] }
 0x462   :  { %v2478_v11 = vmax.f32 %v2474_v5, 0.0  ;;  %v2458_v13 = vmul.f32 %v3881_v22, %v2451_v21  ;;  %v2516_v22 = vld [vmem:[%s4188_s0] sm:$0xff] }
 0x464   :  { %v2502_v32 = vpop.permute.xlu1 %2501  ;;  %v2472_v7 = vadd.f32 %v2465_v56, %v2458_v13 }
 0x465   :  { %v2506_v25 = vadd.f32 %v2502_v32, %v2492_v33  ;;  %v2507_v20 = vadd.f32 %v2502_v32, %v2493_v35  ;;  %v2572_v51 = vadd.f32 %v2568_v26, %v2502_v32  ;;  %v2573_v47 = vadd.f32 %v2569_v3, %v2502_v32 }
 0x466   :  { %v2459_v32 = vmul.f32 %v3885_v28, %v2451_v21  ;;  %v2504_v33 = vadd.f32 %v2497_v53, %v2490_v57  ;;  %v2505_v35 = vadd.f32 %v2497_v53, %v2491_v10  ;;  %v2571_v26 = vadd.f32 %v2567_v19, %v2497_v53  ;;  %v2517_v28 = vld [vmem:[%s4188_s0 + $0x8] sm:$0xff] }
 0x467   :  { %v2510_v42 = vmax.f32 %v2506_v25, 0.0  ;;  %v2511_v61 = vmax.f32 %v2507_v20, 0.0  ;;  %v2576_v31 = vmax.f32 %v2572_v51, 0.0  ;;  %v2577_v34 = vmax.f32 %v2573_v47, 0.0 }
 0x468   :  { %v2473_v37 = vadd.f32 %v2465_v56, %v2459_v32  ;;  %v2554_v25 = vmul.f32 %v3883_v27, %v2451_v21  ;;  %v2555_v20 = vmul.f32 %v3887_v29, %v2451_v21  ;;  %v2508_v16 = vmax.f32 %v2504_v33, 0.0 }
 0x469   :  { %v2514_v63 = vadd.f32 %v2510_v42, %v2478_v11  ;;  %v2515_v12 = vadd.f32 %v2511_v61, %v2479_v45  ;;  %v2580_v18 = vadd.f32 %v2576_v31, %v2564_v9  ;;  %v2581_v1 = vadd.f32 %v2577_v34, %v2565_v24 }
 0x46a   :  { %v2509_v3 = vmax.f32 %v2505_v35, 0.0  ;;  %v2558_v5 = vadd.f32 %v2554_v25, %v2465_v56  ;;  %v2559_v2 = vadd.f32 %v2555_v20, %v2465_v56  ;;  %v2476_v60 = vmax.f32 %v2472_v7, 0.0 }
 0x46b   :  { %v2477_v8 = vmax.f32 %v2473_v37, 0.0  ;;  %v2574_v27 = vmax.f32 %v2570_v36, 0.0  ;;  %v2575_v38 = vmax.f32 %v2571_v26, 0.0 }
 0x46c   :  { %v2512_v29 = vadd.f32 %v2508_v16, %v2476_v60  ;;  %v2562_v42 = vmax.f32 %v2558_v5, 0.0  ;;  %v2563_v61 = vmax.f32 %v2559_v2, 0.0 }
 0x46d   :  { %v2513_v15 = vadd.f32 %v2509_v3, %v2477_v8 }
 0x46e   :  { %v2578_v11 = vadd.f32 %v2574_v27, %v2562_v42  ;;  %v2579_v45 = vadd.f32 %v2575_v38, %v2563_v61 }
 0x487   :  { %v2528_v6 = vpop.permute.xlu1 %2527 }
 0x488   :  { %v2532_v23 = vmul.f32 %v2528_v6, %v2518_v50  ;;  %v2533_v52 = vmul.f32 %v2528_v6, %v2519_v0 }
 0x48a   :  { %v2536_v58 = vadd.f32 %v2532_v23, %v2514_v63  ;;  %v2537_v62 = vadd.f32 %v2533_v52, %v2515_v12 }
 0x48b   :  { %v2595_v54 = vpop.permute.xlu1 %2594 }
 0x48c   :  { %v2540_v48 = vmax.f32 %v2536_v58, 0.0  ;;  %v2541_v59 = vmax.f32 %v2537_v62, 0.0  ;;  %v2599_v14 = vmul.f32 %v2635_v30, %v2595_v54  ;;  %v2600_v4 = vmul.f32 %v2636_v41, %v2595_v54 }
 0x48e   :  { %2544 = vst [vmem:[%s4197_s9 + $0x10] sm:$0xff] %v2540_v48  ;;  %2545 = vst [vmem:[%s4197_s9 + $0x18] sm:$0xff] %v2541_v59  ;;  %v2603_v40 = vadd.f32 %v2599_v14, %v2580_v18  ;;  %v2604_v55 = vadd.f32 %v2600_v4, %v2581_v1 }
 0x490   :  { %v2607_v44 = vmax.f32 %v2603_v40, 0.0  ;;  %v2608_v17 = vmax.f32 %v2604_v55, 0.0 }
 0x492   :  { %2639 = vst [vmem:[%s4197_s9 + $0x30] sm:$0xff] %v2607_v44  ;;  %2640 = vst [vmem:[%s4197_s9 + $0x38] sm:$0xff] %v2608_v17 }
 0x4a3   :  { %v2523_v39 = vpop.permute.xlu0 %2522 }
 0x4a4   :  { %v2530_v51 = vmul.f32 %v2523_v39, %v2516_v22  ;;  %v2531_v47 = vmul.f32 %v2523_v39, %v2517_v28 }
 0x4a6   :  { %v2534_v50 = vadd.f32 %v2530_v51, %v2512_v29  ;;  %v2535_v0 = vadd.f32 %v2531_v47, %v2513_v15 }
 0x4a7   :  { %v2590_v31 = vpop.permute.xlu0 %2589 }
 0x4a8   :  { %v2538_v34 = vmax.f32 %v2534_v50, 0.0  ;;  %v2539_v6 = vmax.f32 %v2535_v0, 0.0  ;;  %v2597_v63 = vmul.f32 %v2633_v43, %v2590_v31  ;;  %v2598_v12 = vmul.f32 %v2634_v49, %v2590_v31 }
 0x4aa   :  { %2542 = vst [vmem:[%s4197_s9] sm:$0xff] %v2538_v34  ;;  %2543 = vst [vmem:[%s4197_s9 + $0x8] sm:$0xff] %v2539_v6  ;;  %v2601_v23 = vadd.f32 %v2597_v63, %v2578_v11  ;;  %v2602_v52 = vadd.f32 %v2598_v12, %v2579_v45 }
 0x4ac   :  { %v2605_v9 = vmax.f32 %v2601_v23, 0.0  ;;  %v2606_v24 = vmax.f32 %v2602_v52, 0.0 }
 0x4ae   :  { %2637 = vst [vmem:[%s4197_s9 + $0x20] sm:$0xff] %v2605_v9  ;;  %2638 = vst [vmem:[%s4197_s9 + $0x28] sm:$0xff] %v2606_v24 }

</bundles_post_ra>
